<compile_context>
chip_gen: v7x
topology: tpu7x:2x2x1
jax: 0.10.0
libtpu: 0.0.40
codegen_flags: <defaults>
</compile_context>

<pallas_src>
import functools
import math

import numpy as np
import jax
import jax.numpy as jnp
from jax import lax
from jax.experimental import pallas as pl
from jax.experimental.pallas import tpu as pltpu


def compute_conv_output_size(Lin, kernel_size, stride=1, padding=0, dilation=1):
    return int(np.floor((Lin + 2 * padding - dilation * (kernel_size - 1) - 1)
                        / float(stride) + 1))


def _round_up(x, m):
    return ((x + m - 1) // m) * m


# ---------------------------------------------------------------------------
# Pallas kernel: one (tm, tn) output tile = [relu](x_tile @ w_tile), full K per block
# ---------------------------------------------------------------------------
def _matmul_relu_kernel(x_ref, w_ref, o_ref, *, apply_relu):
    acc = jnp.dot(x_ref[...], w_ref[...], preferred_element_type=jnp.float32)
    if apply_relu:
        acc = jnp.maximum(acc, 0.0)
    o_ref[...] = acc.astype(o_ref.dtype)


def fused_matmul(x, w, *, relu=False, out_dtype=jnp.bfloat16):
    """out = [relu](x @ w).  bf16 operands on the MXU, f32 accumulation."""
    M, K = x.shape
    K2, N = w.shape
    assert K == K2, (x.shape, w.shape)

    xb = x if x.dtype == jnp.bfloat16 else x.astype(jnp.bfloat16)
    wb = w if w.dtype == jnp.bfloat16 else w.astype(jnp.bfloat16)

    # Pad K/N to lane multiples (128); the M tile is a bf16 sublane multiple (16).
    # K lives fully inside each block (K <= ~2.5k for this network), so there is no
    # K grid axis and no over-padding (conv2: 576 -> 640 instead of 1024).
    Kp = _round_up(K, 128)
    Np = _round_up(N, 128)
    tm = 128 if M >= 128 else _round_up(M, 16)
    Mp = _round_up(M, tm)
    # Largest 128-multiple tile <= 512 that divides Np.  For fc1/fc2 (N=2048) this
    # keeps >= 2 N blocks so the "parallel" axis can shard across v7x's two TCs.
    tn = min(512, Np)
    while Np % tn:
        tn -= 128

    if (Mp, Kp) != (M, K):
        xb = jnp.pad(xb, ((0, Mp - M), (0, Kp - K)))
    if (Kp, Np) != (K, N):
        wb = jnp.pad(wb, ((0, Kp - K), (0, Np - N)))

    grid = (Mp // tm, Np // tn)

    out = pl.pallas_call(
        functools.partial(_matmul_relu_kernel, apply_relu=relu),
        out_shape=jax.ShapeDtypeStruct((Mp, Np), out_dtype),
        grid=grid,
        in_specs=[
            pl.BlockSpec((tm, Kp), lambda i, j: (i, 0)),   # activation tile (full K)
            pl.BlockSpec((Kp, tn), lambda i, j: (0, j)),   # streamed weight tile
        ],
        out_specs=pl.BlockSpec((tm, tn), lambda i, j: (i, j)),
        compiler_params=pltpu.CompilerParams(
            dimension_semantics=("parallel", "parallel"),
            vmem_limit_bytes=32 * 1024 * 1024,
        ),
    )(xb, wb)

    if (Mp, Np) != (M, N):
        out = out[:M, :N]
    return out


def _matmul(x, w, *, relu, out_dtype, use_pallas):
    """Single switch point between the Pallas kernel and the pure-JAX reference."""
    if use_pallas:
        return fused_matmul(x, w, relu=relu, out_dtype=out_dtype)
    acc = jnp.dot(x, w, preferred_element_type=jnp.float32)
    if relu:
        acc = jnp.maximum(acc, 0.0)
    return acc.astype(out_dtype)


# ---------------------------------------------------------------------------
# Conv (valid, stride 1, no bias) + ReLU + 2x2 max-pool via im2col + matmul kernel
# ---------------------------------------------------------------------------
def _im2col(x_nhwc, KH, KW):
    B, H, W, C = x_nhwc.shape
    OH, OW = H - KH + 1, W - KW + 1
    cols = []
    for kh in range(KH):
        for kw in range(KW):
            cols.append(x_nhwc[:, kh:kh + OH, kw:kw + OW, :])       # (B,OH,OW,C)
    patches = jnp.concatenate(cols, axis=-1)                        # (B,OH,OW,KH*KW*C)
    return patches.reshape(B * OH * OW, KH * KW * C), (B, OH, OW)


def _conv_relu_pool(h, w_hwio, use_pallas, pool=2):
    KH, KW, Ci, Co = w_hwio.shape
    patches, (B, OH, OW) = _im2col(h, KH, KW)                       # bf16 patches
    y = _matmul(patches, w_hwio.reshape(KH * KW * Ci, Co),
                relu=True, out_dtype=jnp.bfloat16, use_pallas=use_pallas)
    y = y.reshape(B, OH, OW, Co)
    # Dropout is identity in eval mode; 2x2 max-pool (floor), like nn.MaxPool2d(2).
    return lax.reduce_window(y, jnp.array(-jnp.inf, dtype=y.dtype), lax.max,
                             (1, pool, pool, 1), (1, pool, pool, 1), 'VALID')


# ---------------------------------------------------------------------------
# Full network forward (shared by the Pallas path and the pure-JAX reference)
# ---------------------------------------------------------------------------
@functools.partial(jax.jit, static_argnames=("use_pallas",))
def _forward_impl(x_nchw, conv_ws, fc1_w, fc2_w, last_w, *, use_pallas=True):
    h = jnp.transpose(x_nchw, (0, 2, 3, 1)).astype(jnp.bfloat16)    # NCHW->NHWC, bf16 once
    for w in conv_ws:
        h = _conv_relu_pool(h, w, use_pallas)
    B = h.shape[0]
    # TODO(synk): flatten is NHWC-ordered; porting a PyTorch (NCHW) checkpoint would
    #             require permuting fc1's input columns.
    h = h.reshape(B, -1)
    h = _matmul(h, fc1_w, relu=True, out_dtype=jnp.bfloat16, use_pallas=use_pallas)
    h = _matmul(h, fc2_w, relu=True, out_dtype=jnp.bfloat16, use_pallas=use_pallas)
    return _matmul(h, last_w, relu=False, out_dtype=jnp.float32, use_pallas=use_pallas)


def init_params(key, taskcla, in_ch=3, channels=(64, 128, 256), kernels=(4, 3, 2),
                hidden=2048, input_hw=32):
    keys = jax.random.split(key, len(channels) + 2 + len(taskcla))
    ki = iter(keys)
    convs = []
    s = input_hw
    cin = in_ch
    for cout, k in zip(channels, kernels):
        w = jax.random.normal(next(ki), (k, k, cin, cout), jnp.float32)
        w = w * (1.0 / math.sqrt(k * k * cin))
        convs.append(w.astype(jnp.bfloat16))                 # cast to bf16 ONCE at init
        s = compute_conv_output_size(s, k) // 2
        cin = cout
    smid = s
    flat = channels[-1] * smid * smid
    fc1 = (jax.random.normal(next(ki), (flat, hidden), jnp.float32)
           / math.sqrt(flat)).astype(jnp.bfloat16)
    fc2 = (jax.random.normal(next(ki), (hidden, hidden), jnp.float32)
           / math.sqrt(hidden)).astype(jnp.bfloat16)
    last = [(jax.random.normal(next(ki), (hidden, n), jnp.float32)
             / math.sqrt(hidden)).astype(jnp.bfloat16) for _, n in taskcla]
    return dict(convs=convs, fc1=fc1, fc2=fc2, last=last, smid=smid)


class StructuredSubnetAlexNetV3:
    """JAX/Pallas port of StructuredSubnetAlexNet_v3 (inference forward)."""

    def __init__(self, taskcla, sparsity=0.5, channels=(64, 128, 256),
                 hidden=2048, seed=0):
        self.taskcla = taskcla
        self.sparsity = sparsity   # unused at inference (subnet scoring not provided)
        self.params = init_params(jax.random.PRNGKey(seed), taskcla,
                                  channels=channels, hidden=hidden)

    def _weights(self, mask):
        p = self.params
        convs, fc1, fc2 = list(p['convs']), p['fc1'], p['fc2']
        if mask is not None:
            # Binary masks multiply exactly in bf16 (no weight re-cast).
            # TODO(synk): cache masked bf16 weights across calls instead of
            #             re-multiplying per forward.
            def _m(w, key):
                mk = mask.get(key)
                return w if mk is None else w * mk.astype(w.dtype)
            convs = [_m(w, 'conv{}.weight'.format(i + 1)) for i, w in enumerate(convs)]
            fc1 = _m(fc1, 'fc1.weight')
            fc2 = _m(fc2, 'fc2.weight')
        return tuple(convs), fc1, fc2

    def __call__(self, x_nchw, task_id, mask=None, mode='eval'):
        # TODO(synk): mode='train' (stochastic Dropout / learned score-based subnet
        #             selection) is not implemented; deterministic eval forward only.
        convs, fc1, fc2 = self._weights(mask)
        return _forward_impl(x_nchw, convs, fc1, fc2, self.params['last'][task_id],
                             use_pallas=True)

    def reference(self, x_nchw, task_id, mask=None):
        """Pure-JAX reference: identical decomposition, jnp.dot instead of Pallas."""
        convs, fc1, fc2 = self._weights(mask)
        return _forward_impl(x_nchw, convs, fc1, fc2, self.params['last'][task_id],
                             use_pallas=False)


if __name__ == "__main__":
    # Small shapes consistent with the module: CIFAR-like (B, 3, 32, 32) input,
    # reduced channel widths / hidden size for a quick self-test.
    taskcla = [(0, 10), (1, 10), (2, 10)]
    model = StructuredSubnetAlexNetV3(taskcla, channels=(32, 64, 128),
                                      hidden=256, seed=0)

    x = jax.random.normal(jax.random.PRNGKey(0), (2, 3, 32, 32), jnp.float32)
    task_id = 1

    out = jax.block_until_ready(model(x, task_id, mask=None, mode='eval'))
    assert out.shape == (2, 10), out.shape
    assert bool(jnp.all(jnp.isfinite(out)))

    ref = jax.block_until_ready(model.reference(x, task_id, mask=None))
    max_err = float(jnp.max(jnp.abs(out - ref)))
    assert jnp.allclose(out, ref, atol=2e-2, rtol=2e-2), max_err

    print("KERNEL_OK")
</pallas_src>

<mosaic_0001>
module attributes {stable_mosaic.version = 11 : i64} {
  func.func @_matmul_relu_kernel(%arg0: i32, %arg1: i32, %arg2: memref<128x128xbf16, #tpu.memory_space<vmem>>, %arg3: memref<128x128xbf16, #tpu.memory_space<vmem>>, %arg4: memref<128x128xbf16, #tpu.memory_space<vmem>>) attributes {dimension_semantics = [#tpu.dimension_semantics<parallel>, #tpu.dimension_semantics<parallel>], iteration_bounds = array<i64: 14, 1>, scalar_prefetch = 0 : i64, scratch_operands = 0 : i64, tpu.core_type = #tpu.core_type<tc>, window_params = [{transform_indices = @transform_0, window_bounds = array<i64: 128, 128>}, {transform_indices = @transform_1, window_bounds = array<i64: 128, 128>}, {transform_indices = @transform_2, window_bounds = array<i64: 128, 128>}]} {
    %c0 = arith.constant 0 : index
    %c0_0 = arith.constant 0 : index
    %0 = vector.load %arg2[%c0, %c0_0] : memref<128x128xbf16, #tpu.memory_space<vmem>>, vector<128x128xbf16>
    %c0_1 = arith.constant 0 : index
    %c0_2 = arith.constant 0 : index
    %1 = vector.load %arg3[%c0_1, %c0_2] : memref<128x128xbf16, #tpu.memory_space<vmem>>, vector<128x128xbf16>
    %cst = arith.constant dense<0.000000e+00> : vector<128x128xf32>
    %2 = tpu.matmul %0, %1, %cst {dimension_numbers = #tpu.dot_dimension_numbers<[1], [0], [0], [1], [0, 0, 1, 1], [], []>} : vector<128x128xbf16>, vector<128x128xbf16>, vector<128x128xf32> -> vector<128x128xf32>
    %cst_3 = arith.constant 0.000000e+00 : f32
    %3 = vector.broadcast %cst_3 : f32 to vector<128x128xf32>
    %4 = arith.maximumf %2, %3 : vector<128x128xf32>
    %5 = arith.truncf %4 : vector<128x128xf32> to vector<128x128xbf16>
    %c0_4 = arith.constant 0 : index
    %c0_5 = arith.constant 0 : index
    %6 = vector.load %arg4[%c0_4, %c0_5] : memref<128x128xbf16, #tpu.memory_space<vmem>>, vector<128x128xbf16>
    tpu.vector_store %arg4[%c0_4, %c0_5], %5 {strides = array<i32>} : memref<128x128xbf16, #tpu.memory_space<vmem>>, vector<128x128xbf16>,
    return
  }
  func.func @transform_0(%arg0: i32, %arg1: i32) -> (i32, i32) {
    %c0_i32 = arith.constant 0 : i32
    %c0_i32_0 = arith.constant 0 : i32
    return %arg0, %c0_i32 : i32, i32
  }
  func.func @transform_1(%arg0: i32, %arg1: i32) -> (i32, i32) {
    %c0_i32 = arith.constant 0 : i32
    %c0_i32_0 = arith.constant 0 : i32
    return %c0_i32, %arg1 : i32, i32
  }
  func.func @transform_2(%arg0: i32, %arg1: i32) -> (i32, i32) {
    %c0_i32 = arith.constant 0 : i32
    return %arg0, %arg1 : i32, i32
  }
}

module attributes {stable_mosaic.version = 11 : i64} {
  func.func @_matmul_relu_kernel(%arg0: i32, %arg1: i32, %arg2: memref<128x384xbf16, #tpu.memory_space<vmem>>, %arg3: memref<384x128xbf16, #tpu.memory_space<vmem>>, %arg4: memref<128x128xbf16, #tpu.memory_space<vmem>>) attributes {dimension_semantics = [#tpu.dimension_semantics<parallel>, #tpu.dimension_semantics<parallel>], iteration_bounds = array<i64: 3, 1>, scalar_prefetch = 0 : i64, scratch_operands = 0 : i64, tpu.core_type = #tpu.core_type<tc>, window_params = [{transform_indices = @transform_0, window_bounds = array<i64: 128, 384>}, {transform_indices = @transform_1, window_bounds = array<i64: 384, 128>}, {transform_indices = @transform_2, window_bounds = array<i64: 128, 128>}]} {
    %c0 = arith.constant 0 : index
    %c0_0 = arith.constant 0 : index
    %0 = vector.load %arg2[%c0, %c0_0] : memref<128x384xbf16, #tpu.memory_space<vmem>>, vector<128x384xbf16>
    %c0_1 = arith.constant 0 : index
    %c0_2 = arith.constant 0 : index
    %1 = vector.load %arg3[%c0_1, %c0_2] : memref<384x128xbf16, #tpu.memory_space<vmem>>, vector<384x128xbf16>
    %cst = arith.constant dense<0.000000e+00> : vector<128x128xf32>
    %2 = tpu.matmul %0, %1, %cst {dimension_numbers = #tpu.dot_dimension_numbers<[1], [0], [0], [1], [0, 0, 1, 1], [], []>} : vector<128x384xbf16>, vector<384x128xbf16>, vector<128x128xf32> -> vector<128x128xf32>
    %cst_3 = arith.constant 0.000000e+00 : f32
    %3 = vector.broadcast %cst_3 : f32 to vector<128x128xf32>
    %4 = arith.maximumf %2, %3 : vector<128x128xf32>
    %5 = arith.truncf %4 : vector<128x128xf32> to vector<128x128xbf16>
    %c0_4 = arith.constant 0 : index
    %c0_5 = arith.constant 0 : index
    %6 = vector.load %arg4[%c0_4, %c0_5] : memref<128x128xbf16, #tpu.memory_space<vmem>>, vector<128x128xbf16>
    tpu.vector_store %arg4[%c0_4, %c0_5], %5 {strides = array<i32>} : memref<128x128xbf16, #tpu.memory_space<vmem>>, vector<128x128xbf16>,
    return
  }
  func.func @transform_0(%arg0: i32, %arg1: i32) -> (i32, i32) {
    %c0_i32 = arith.constant 0 : i32
    %c0_i32_0 = arith.constant 0 : i32
    return %arg0, %c0_i32 : i32, i32
  }
  func.func @transform_1(%arg0: i32, %arg1: i32) -> (i32, i32) {
    %c0_i32 = arith.constant 0 : i32
    %c0_i32_0 = arith.constant 0 : i32
    return %c0_i32, %arg1 : i32, i32
  }
  func.func @transform_2(%arg0: i32, %arg1: i32) -> (i32, i32) {
    %c0_i32 = arith.constant 0 : i32
    return %arg0, %arg1 : i32, i32
  }
}

module attributes {stable_mosaic.version = 11 : i64} {
  func.func @_matmul_relu_kernel(%arg0: i32, %arg1: i32, %arg2: memref<64x256xbf16, #tpu.memory_space<vmem>>, %arg3: memref<256x128xbf16, #tpu.memory_space<vmem>>, %arg4: memref<64x128xbf16, #tpu.memory_space<vmem>>) attributes {dimension_semantics = [#tpu.dimension_semantics<parallel>, #tpu.dimension_semantics<parallel>], iteration_bounds = array<i64: 1, 1>, scalar_prefetch = 0 : i64, scratch_operands = 0 : i64, tpu.core_type = #tpu.core_type<tc>, window_params = [{transform_indices = @transform_0, window_bounds = array<i64: 64, 256>}, {transform_indices = @transform_1, window_bounds = array<i64: 256, 128>}, {transform_indices = @transform_2, window_bounds = array<i64: 64, 128>}]} {
    %c0 = arith.constant 0 : index
    %c0_0 = arith.constant 0 : index
    %0 = vector.load %arg2[%c0, %c0_0] : memref<64x256xbf16, #tpu.memory_space<vmem>>, vector<64x256xbf16>
    %c0_1 = arith.constant 0 : index
    %c0_2 = arith.constant 0 : index
    %1 = vector.load %arg3[%c0_1, %c0_2] : memref<256x128xbf16, #tpu.memory_space<vmem>>, vector<256x128xbf16>
    %cst = arith.constant dense<0.000000e+00> : vector<64x128xf32>
    %2 = tpu.matmul %0, %1, %cst {dimension_numbers = #tpu.dot_dimension_numbers<[1], [0], [0], [1], [0, 0, 1, 1], [], []>} : vector<64x256xbf16>, vector<256x128xbf16>, vector<64x128xf32> -> vector<64x128xf32>
    %cst_3 = arith.constant 0.000000e+00 : f32
    %3 = vector.broadcast %cst_3 : f32 to vector<64x128xf32>
    %4 = arith.maximumf %2, %3 : vector<64x128xf32>
    %5 = arith.truncf %4 : vector<64x128xf32> to vector<64x128xbf16>
    %c0_4 = arith.constant 0 : index
    %c0_5 = arith.constant 0 : index
    %6 = vector.load %arg4[%c0_4, %c0_5] : memref<64x128xbf16, #tpu.memory_space<vmem>>, vector<64x128xbf16>
    tpu.vector_store %arg4[%c0_4, %c0_5], %5 {strides = array<i32>} : memref<64x128xbf16, #tpu.memory_space<vmem>>, vector<64x128xbf16>,
    return
  }
  func.func @transform_0(%arg0: i32, %arg1: i32) -> (i32, i32) {
    %c0_i32 = arith.constant 0 : i32
    %c0_i32_0 = arith.constant 0 : i32
    return %arg0, %c0_i32 : i32, i32
  }
  func.func @transform_1(%arg0: i32, %arg1: i32) -> (i32, i32) {
    %c0_i32 = arith.constant 0 : i32
    %c0_i32_0 = arith.constant 0 : i32
    return %c0_i32, %arg1 : i32, i32
  }
  func.func @transform_2(%arg0: i32, %arg1: i32) -> (i32, i32) {
    %c0_i32 = arith.constant 0 : i32
    return %arg0, %arg1 : i32, i32
  }
}

module attributes {stable_mosaic.version = 11 : i64} {
  func.func @_matmul_relu_kernel(%arg0: i32, %arg1: i32, %arg2: memref<16x512xbf16, #tpu.memory_space<vmem>>, %arg3: memref<512x256xbf16, #tpu.memory_space<vmem>>, %arg4: memref<16x256xbf16, #tpu.memory_space<vmem>>) attributes {dimension_semantics = [#tpu.dimension_semantics<parallel>, #tpu.dimension_semantics<parallel>], iteration_bounds = array<i64: 1, 1>, scalar_prefetch = 0 : i64, scratch_operands = 0 : i64, tpu.core_type = #tpu.core_type<tc>, window_params = [{transform_indices = @transform_0, window_bounds = array<i64: 16, 512>}, {transform_indices = @transform_1, window_bounds = array<i64: 512, 256>}, {transform_indices = @transform_2, window_bounds = array<i64: 16, 256>}]} {
    %c0 = arith.constant 0 : index
    %c0_0 = arith.constant 0 : index
    %0 = vector.load %arg2[%c0, %c0_0] : memref<16x512xbf16, #tpu.memory_space<vmem>>, vector<16x512xbf16>
    %c0_1 = arith.constant 0 : index
    %c0_2 = arith.constant 0 : index
    %1 = vector.load %arg3[%c0_1, %c0_2] : memref<512x256xbf16, #tpu.memory_space<vmem>>, vector<512x256xbf16>
    %cst = arith.constant dense<0.000000e+00> : vector<16x256xf32>
    %2 = tpu.matmul %0, %1, %cst {dimension_numbers = #tpu.dot_dimension_numbers<[1], [0], [0], [1], [0, 0, 1, 1], [], []>} : vector<16x512xbf16>, vector<512x256xbf16>, vector<16x256xf32> -> vector<16x256xf32>
    %cst_3 = arith.constant 0.000000e+00 : f32
    %3 = vector.broadcast %cst_3 : f32 to vector<16x256xf32>
    %4 = arith.maximumf %2, %3 : vector<16x256xf32>
    %5 = arith.truncf %4 : vector<16x256xf32> to vector<16x256xbf16>
    %c0_4 = arith.constant 0 : index
    %c0_5 = arith.constant 0 : index
    %6 = vector.load %arg4[%c0_4, %c0_5] : memref<16x256xbf16, #tpu.memory_space<vmem>>, vector<16x256xbf16>
    tpu.vector_store %arg4[%c0_4, %c0_5], %5 {strides = array<i32>} : memref<16x256xbf16, #tpu.memory_space<vmem>>, vector<16x256xbf16>,
    return
  }
  func.func @transform_0(%arg0: i32, %arg1: i32) -> (i32, i32) {
    %c0_i32 = arith.constant 0 : i32
    %c0_i32_0 = arith.constant 0 : i32
    return %arg0, %c0_i32 : i32, i32
  }
  func.func @transform_1(%arg0: i32, %arg1: i32) -> (i32, i32) {
    %c0_i32 = arith.constant 0 : i32
    %c0_i32_0 = arith.constant 0 : i32
    return %c0_i32, %arg1 : i32, i32
  }
  func.func @transform_2(%arg0: i32, %arg1: i32) -> (i32, i32) {
    %c0_i32 = arith.constant 0 : i32
    return %arg0, %arg1 : i32, i32
  }
}

module attributes {stable_mosaic.version = 11 : i64} {
  func.func @_matmul_relu_kernel(%arg0: i32, %arg1: i32, %arg2: memref<16x256xbf16, #tpu.memory_space<vmem>>, %arg3: memref<256x256xbf16, #tpu.memory_space<vmem>>, %arg4: memref<16x256xbf16, #tpu.memory_space<vmem>>) attributes {dimension_semantics = [#tpu.dimension_semantics<parallel>, #tpu.dimension_semantics<parallel>], iteration_bounds = array<i64: 1, 1>, scalar_prefetch = 0 : i64, scratch_operands = 0 : i64, tpu.core_type = #tpu.core_type<tc>, window_params = [{transform_indices = @transform_0, window_bounds = array<i64: 16, 256>}, {transform_indices = @transform_1, window_bounds = array<i64: 256, 256>}, {transform_indices = @transform_2, window_bounds = array<i64: 16, 256>}]} {
    %c0 = arith.constant 0 : index
    %c0_0 = arith.constant 0 : index
    %0 = vector.load %arg2[%c0, %c0_0] : memref<16x256xbf16, #tpu.memory_space<vmem>>, vector<16x256xbf16>
    %c0_1 = arith.constant 0 : index
    %c0_2 = arith.constant 0 : index
    %1 = vector.load %arg3[%c0_1, %c0_2] : memref<256x256xbf16, #tpu.memory_space<vmem>>, vector<256x256xbf16>
    %cst = arith.constant dense<0.000000e+00> : vector<16x256xf32>
    %2 = tpu.matmul %0, %1, %cst {dimension_numbers = #tpu.dot_dimension_numbers<[1], [0], [0], [1], [0, 0, 1, 1], [], []>} : vector<16x256xbf16>, vector<256x256xbf16>, vector<16x256xf32> -> vector<16x256xf32>
    %cst_3 = arith.constant 0.000000e+00 : f32
    %3 = vector.broadcast %cst_3 : f32 to vector<16x256xf32>
    %4 = arith.maximumf %2, %3 : vector<16x256xf32>
    %5 = arith.truncf %4 : vector<16x256xf32> to vector<16x256xbf16>
    %c0_4 = arith.constant 0 : index
    %c0_5 = arith.constant 0 : index
    %6 = vector.load %arg4[%c0_4, %c0_5] : memref<16x256xbf16, #tpu.memory_space<vmem>>, vector<16x256xbf16>
    tpu.vector_store %arg4[%c0_4, %c0_5], %5 {strides = array<i32>} : memref<16x256xbf16, #tpu.memory_space<vmem>>, vector<16x256xbf16>,
    return
  }
  func.func @transform_0(%arg0: i32, %arg1: i32) -> (i32, i32) {
    %c0_i32 = arith.constant 0 : i32
    %c0_i32_0 = arith.constant 0 : i32
    return %arg0, %c0_i32 : i32, i32
  }
  func.func @transform_1(%arg0: i32, %arg1: i32) -> (i32, i32) {
    %c0_i32 = arith.constant 0 : i32
    %c0_i32_0 = arith.constant 0 : i32
    return %c0_i32, %arg1 : i32, i32
  }
  func.func @transform_2(%arg0: i32, %arg1: i32) -> (i32, i32) {
    %c0_i32 = arith.constant 0 : i32
    return %arg0, %arg1 : i32, i32
  }
}

module attributes {stable_mosaic.version = 11 : i64} {
  func.func @_matmul_relu_kernel(%arg0: i32, %arg1: i32, %arg2: memref<16x256xbf16, #tpu.memory_space<vmem>>, %arg3: memref<256x128xbf16, #tpu.memory_space<vmem>>, %arg4: memref<16x128xf32, #tpu.memory_space<vmem>>) attributes {dimension_semantics = [#tpu.dimension_semantics<parallel>, #tpu.dimension_semantics<parallel>], iteration_bounds = array<i64: 1, 1>, scalar_prefetch = 0 : i64, scratch_operands = 0 : i64, tpu.core_type = #tpu.core_type<tc>, window_params = [{transform_indices = @transform_0, window_bounds = array<i64: 16, 256>}, {transform_indices = @transform_1, window_bounds = array<i64: 256, 128>}, {transform_indices = @transform_2, window_bounds = array<i64: 16, 128>}]} {
    %c0 = arith.constant 0 : index
    %c0_0 = arith.constant 0 : index
    %0 = vector.load %arg2[%c0, %c0_0] : memref<16x256xbf16, #tpu.memory_space<vmem>>, vector<16x256xbf16>
    %c0_1 = arith.constant 0 : index
    %c0_2 = arith.constant 0 : index
    %1 = vector.load %arg3[%c0_1, %c0_2] : memref<256x128xbf16, #tpu.memory_space<vmem>>, vector<256x128xbf16>
    %cst = arith.constant dense<0.000000e+00> : vector<16x128xf32>
    %2 = tpu.matmul %0, %1, %cst {dimension_numbers = #tpu.dot_dimension_numbers<[1], [0], [0], [1], [0, 0, 1, 1], [], []>} : vector<16x256xbf16>, vector<256x128xbf16>, vector<16x128xf32> -> vector<16x128xf32>
    %c0_3 = arith.constant 0 : index
    %c0_4 = arith.constant 0 : index
    %3 = vector.load %arg4[%c0_3, %c0_4] : memref<16x128xf32, #tpu.memory_space<vmem>>, vector<16x128xf32>
    tpu.vector_store %arg4[%c0_3, %c0_4], %2 {strides = array<i32>} : memref<16x128xf32, #tpu.memory_space<vmem>>, vector<16x128xf32>,
    return
  }
  func.func @transform_0(%arg0: i32, %arg1: i32) -> (i32, i32) {
    %c0_i32 = arith.constant 0 : i32
    %c0_i32_0 = arith.constant 0 : i32
    return %arg0, %c0_i32 : i32, i32
  }
  func.func @transform_1(%arg0: i32, %arg1: i32) -> (i32, i32) {
    %c0_i32 = arith.constant 0 : i32
    %c0_i32_0 = arith.constant 0 : i32
    return %c0_i32, %arg1 : i32, i32
  }
  func.func @transform_2(%arg0: i32, %arg1: i32) -> (i32, i32) {
    %c0_i32 = arith.constant 0 : i32
    return %arg0, %arg1 : i32, i32
  }
}

</mosaic_0001>

<bundles_post_ra>
// kernel: _forward_impl.6
= control target key start
LH: loop header
LB: loop body
LE: loop exit
PB: predicated region body
PF: predicated region fallthrough
CT: control target
= control target key end

     0   :  { %s846_s9 = smov 0   ;;  %s848_s10 = smov 0   ;;  %s930_s0 = inlined_call_operand.vmem [shape: bf16[1792,128], index: 0, kind: input, shape index: {}]   ;;  %s931_s1 = inlined_call_operand.vmem [shape: bf16[128,128], index: 1, kind: input, shape index: {}]   ;;  %s932_s2 = inlined_call_operand.vmem [shape: bf16[1792,128], index: 2, kind: output, shape index: {}]  }
   0x1   :  { %s850_s11 = smov 0  }
   0x2 LB: > { %s24_s12 = sadd.s32 1, %s825_s10  ;;  %p601_p0 = scmp.ge.s32.totalorder %s829_s11, 1  ;;  %s829_s11 = sphi %s850_s11, %s12_s11   ;;  %s825_s10 = sphi %s848_s10, %s934_s10   ;;  %s821_s9 = sphi %s846_s9, %s933_s9  }
   0x3   : > { %p26_p1 = scmp.ge.s32.totalorder %s24_s12, 14  ;;  %p136_p2 = scmp.lt.s32.totalorder %s829_s11, 15 }
   0x5   : > { %s936_s12 = smov (%p26_p1, %s24_s12), 0  ;;  %p137_p3 = pnand %p601_p0, %p136_p2 }
   0x6   : > { %v791_v0 = vld [vmem:[%s931_s1] sm:$0xff] (!%p137_p3)   ;;  %s602_s15 = sshll.u32 (!%p137_p3), %s821_s9, 4  ;;  %v792_v1 = vld [vmem:[%s931_s1 + $0x8] sm:$0xff] (!%p137_p3)   ;;  %v793_v2 = vld [vmem:[%s931_s1 + $0x10] sm:$0xff] (!%p137_p3)  }
   0x7   : > { %140 = sbr.rel (%p137_p3) target bundleno = 267 (0x10b), region = 28  ;;  %p166_p4 = scmp.lt.s32.totalorder (!%p137_p3), %s602_s15, 223  ;;  %719 = vmatprep.subr.bf16.mxu0 (!%p137_p3), %v791_v0  ;;  %751 = vmatprep.subr.bf16.mxu1 (!%p137_p3), %v791_v0  ;;  %v794_v3 = vld [vmem:[%s931_s1 + $0x18] sm:$0xff] (!%p137_p3)   ;;  %v795_v6 = vld [vmem:[%s931_s1 + $0x20] sm:$0xff] (!%p137_p3)   ;;  %v796_v7 = vld [vmem:[%s931_s1 + $0x28] sm:$0xff] (!%p137_p3)  }
   0x8   : > { %720 = vmatpush3.bf16.msra.mxu0 (!%p137_p3), %v791_v0  ;;  %759 = vmatpush3.bf16.msra.mxu1 (!%p137_p3), %v791_v0  ;;  %v797_v8 = vld [vmem:[%s931_s1 + $0x30] sm:$0xff] (!%p137_p3)   ;;  %v798_v9 = vld [vmem:[%s931_s1 + $0x38] sm:$0xff] (!%p137_p3)  }
   0x9   : > { %721 = vmatprep.subr.bf16.mxu0 (!%p137_p3), %v792_v1  ;;  %752 = vmatprep.subr.bf16.mxu1 (!%p137_p3), %v792_v1 }
   0xc   : > { %722 = vmatpush3.bf16.msra.mxu0 (!%p137_p3), %v792_v1  ;;  %760 = vmatpush3.bf16.msra.mxu1 (!%p137_p3), %v792_v1 }
   0xd   : > { %723 = vmatprep.subr.bf16.mxu0 (!%p137_p3), %v793_v2  ;;  %753 = vmatprep.subr.bf16.mxu1 (!%p137_p3), %v793_v2 }
   0xe   : > { %s938_s15 = smov (!%p166_p4, %s602_s15), 223 }
   0xf   : > { %s603_s20 = sshll.u32 %s938_s15, 2 }
  0x10   : > { %s881_s23 = scalar_lea.vmem %s930_s0, %s603_s20  ;;  %724 = vmatpush3.bf16.msra.mxu0 %v793_v2  ;;  %761 = vmatpush3.bf16.msra.mxu1 %v793_v2  ;;  %s911_s8 = scalar_lea.vmem %s932_s2, %s603_s20 }
  0x11   : > { %v799_v4 = vld [vmem:[%s881_s23] sm:$0xff]   ;;  %725 = vmatprep.subr.bf16.mxu0 %v794_v3  ;;  %754 = vmatprep.subr.bf16.mxu1 %v794_v3  ;;  %v801_v10 = vld [vmem:[%s881_s23 + $0x8] sm:$0xff]   ;;  %v803_v12 = vld [vmem:[%s881_s23 + $0x10] sm:$0xff]  }
  0x12   : > { %v800_v5 = vld [vmem:[%s881_s23 + $0x20] sm:$0xff]   ;;  %735 = vmatprep.mubr.bf16.mxu0 %v799_v4  ;;  %v802_v11 = vld [vmem:[%s881_s23 + $0x28] sm:$0xff]   ;;  %v804_v13 = vld [vmem:[%s881_s23 + $0x30] sm:$0xff]  }
  0x13   : > { %743 = vmatprep.mubr.bf16.mxu1 %v800_v5  ;;  %v805_v14 = vld [vmem:[%s881_s23 + $0x18] sm:$0xff]  }
  0x14   : > { %726 = vmatpush3.bf16.msra.mxu0 %v794_v3  ;;  %762 = vmatpush3.bf16.msra.mxu1 %v794_v3  ;;  %v806_v15 = vld [vmem:[%s881_s23 + $0x38] sm:$0xff]  }
  0x15   : > { %727 = vmatprep.subr.bf16.mxu0 %v795_v6  ;;  %755 = vmatprep.subr.bf16.mxu1 %v795_v6 }
  0x18   : > { %728 = vmatpush3.bf16.msra.mxu0 %v795_v6  ;;  %763 = vmatpush3.bf16.msra.mxu1 %v795_v6 }
  0x19   : > { %729 = vmatprep.subr.bf16.mxu0 %v796_v7  ;;  %756 = vmatprep.subr.bf16.mxu1 %v796_v7 }
  0x1c   : > { %730 = vmatpush3.bf16.msra.mxu0 %v796_v7  ;;  %764 = vmatpush3.bf16.msra.mxu1 %v796_v7 }
  0x1d   : > { %731 = vmatprep.subr.bf16.mxu0 %v797_v8  ;;  %757 = vmatprep.subr.bf16.mxu1 %v797_v8 }
  0x20   : > { %732 = vmatpush3.bf16.msra.mxu0 %v797_v8  ;;  %765 = vmatpush3.bf16.msra.mxu1 %v797_v8 }
  0x21   : > { %733 = vmatprep.subr.bf16.mxu0 %v798_v9  ;;  %758 = vmatprep.subr.bf16.mxu1 %v798_v9 }
  0x24   : > { %734 = vmatpush3.bf16.msra.mxu0 %v798_v9  ;;  %766 = vmatpush3.bf16.msra.mxu1 %v798_v9 }
  0x27   : > { %736 = vmatmul.mubr.bf16.vlgmr.msra.gmra.mrb[0].mxu0 %v801_v10  ;;  %744 = vmatmul.mubr.bf16.vlgmr.msra.gmra.mrb[0].mxu1 %v802_v11 }
  0x28   : > { %739 = vmatprep.mubr.bf16.mxu0 %v803_v12  ;;  %747 = vmatprep.mubr.bf16.mxu1 %v804_v13 }
  0x2f   : > { %740 = vmatmul.mubr.bf16.gmra.mrb[4].mxu0 %v805_v14  ;;  %748 = vmatmul.mubr.bf16.gmra.mrb[4].mxu1 %v806_v15 }
  0xfa   : > { %v737_v16 = vpop.f32.mrb[0].mxu0  ;;  %v745_v17 = vpop.f32.mrb[0].mxu1 }
  0xfb   : > { %v347_v18 = vpop.f32.mrb[1].mxu0  ;;  %v379_v19 = vpop.f32.mrb[1].mxu1  ;;  %v412_v22 = vmax.f32 %v737_v16, 0.0  ;;  %v420_v23 = vmax.f32 %v745_v17, 0.0 }
  0xfc   : > { %v738_v20 = vpop.f32.mrb[2].mxu0  ;;  %v746_v21 = vpop.f32.mrb[2].mxu1  ;;  %v410_v28 = vmax.f32 %v347_v18, 0.0  ;;  %v418_v29 = vmax.f32 %v379_v19, 0.0 }
  0xfd   : > { %v413_v24 = vmax.f32 %v738_v20, 0.0  ;;  %v421_v25 = vmax.f32 %v746_v21, 0.0  ;;  %v350_v26 = vpop.f32.mrb[3].mxu0  ;;  %v382_v27 = vpop.f32.mrb[3].mxu1 }
  0xfe   : > { %v411_v30 = vmax.f32 %v350_v26, 0.0  ;;  %v419_v31 = vmax.f32 %v382_v27, 0.0 }
  0xff   : > { %v664_v32 = vpack.c.bf16 %v413_v24, %v412_v22  ;;  %v684_v33 = vpack.c.bf16 %v421_v25, %v420_v23 }
 0x100   : > { %v659_v34 = vpack.c.bf16 %v411_v30, %v410_v28  ;;  %v679_v35 = vpack.c.bf16 %v419_v31, %v418_v29 }
 0x101   : > { %696 = vst [vmem:[%s911_s8 + $0x8] sm:$0xff] %v664_v32   ;;  %700 = vst [vmem:[%s911_s8 + $0x28] sm:$0xff] %v684_v33  }
 0x102   : > { %660 = vst [vmem:[%s911_s8] sm:$0xff] %v659_v34   ;;  %699 = vst [vmem:[%s911_s8 + $0x20] sm:$0xff] %v679_v35   ;;  %v741_v36 = vpop.f32.mrb[4].mxu0  ;;  %v749_v37 = vpop.f32.mrb[4].mxu1 }
 0x103   : > { %v363_v38 = vpop.f32.mrb[5].mxu0  ;;  %v395_v39 = vpop.f32.mrb[5].mxu1  ;;  %v416_v42 = vmax.f32 %v741_v36, 0.0  ;;  %v424_v43 = vmax.f32 %v749_v37, 0.0 }
 0x104   : > { %v742_v40 = vpop.f32.mrb[6].mxu0  ;;  %v750_v41 = vpop.f32.mrb[6].mxu1  ;;  %v414_v48 = vmax.f32 %v363_v38, 0.0  ;;  %v422_v49 = vmax.f32 %v395_v39, 0.0 }
 0x105   : > { %v417_v44 = vmax.f32 %v742_v40, 0.0  ;;  %v425_v45 = vmax.f32 %v750_v41, 0.0  ;;  %v366_v46 = vpop.f32.mrb[7].mxu0  ;;  %v398_v47 = vpop.f32.mrb[7].mxu1 }
 0x106   : > { %v415_v50 = vmax.f32 %v366_v46, 0.0  ;;  %v423_v51 = vmax.f32 %v398_v47, 0.0 }
 0x107   : > { %v674_v52 = vpack.c.bf16 %v417_v44, %v416_v42  ;;  %v694_v53 = vpack.c.bf16 %v425_v45, %v424_v43 }
 0x108   : > { %v669_v54 = vpack.c.bf16 %v415_v50, %v414_v48  ;;  %v689_v55 = vpack.c.bf16 %v423_v51, %v422_v49 }
 0x109   : > { %698 = vst [vmem:[%s911_s8 + $0x18] sm:$0xff] %v674_v52   ;;  %702 = vst [vmem:[%s911_s8 + $0x38] sm:$0xff] %v694_v53  }
 0x10a   : > { %697 = vst [vmem:[%s911_s8 + $0x10] sm:$0xff] %v669_v54   ;;  %701 = vst [vmem:[%s911_s8 + $0x30] sm:$0xff] %v689_v55  }
 0x10b PF: > { %s12_s11 = sadd.s32 1, %s829_s11   ;;  %s933_s9 = smov %s825_s10 }
 0x10c   : > { %p9_p5 = scmp.ge.s32.totalorder %s12_s11, 16   ;;  %s934_s10 = smov %s936_s12 }
 0x10e   :  { %11 = sbr.rel (!%p9_p5) target bundleno = 2 (0x2), region = 61 }

// kernel: _forward_impl.7
= control target key start
LH: loop header
LB: loop body
LE: loop exit
PB: predicated region body
PF: predicated region fallthrough
CT: control target
= control target key end

     0   :  { %s1291_s9 = smov 0   ;;  %s1293_s10 = smov 0   ;;  %s1439_s0 = inlined_call_operand.vmem [shape: bf16[384,384], index: 0, kind: input, shape index: {}]   ;;  %s1440_s1 = inlined_call_operand.vmem [shape: bf16[384,128], index: 1, kind: input, shape index: {}]   ;;  %s1441_s2 = inlined_call_operand.vmem [shape: bf16[384,128], index: 2, kind: output, shape index: {}]  }
   0x1   :  { %s1295_s11 = smov 0  }
   0x2 LB: > { %s24_s12 = sadd.s32 1, %s1270_s10  ;;  %p925_p0 = scmp.ge.s32.totalorder %s1274_s11, 1  ;;  %s1274_s11 = sphi %s1295_s11, %s12_s11   ;;  %s1270_s10 = sphi %s1293_s10, %s1443_s10   ;;  %s1266_s9 = sphi %s1291_s9, %s1442_s9  }
   0x3   : > { %p26_p1 = scmp.ge.s32.totalorder %s24_s12, 3  ;;  %p137_p2 = scmp.lt.s32.totalorder %s1274_s11, 4 }
   0x5   : > { %s1445_s12 = smov (%p26_p1, %s24_s12), 0  ;;  %p138_p3 = pnand %p925_p0, %p137_p2 }
   0x6   : > { %v1196_v0 = vld [vmem:[%s1440_s1 + $0x40] sm:$0xff] (!%p138_p3)   ;;  %v1199_v3 = vld [vmem:[%s1440_s1 + $0x48] sm:$0xff] (!%p138_p3)   ;;  %v1202_v6 = vld [vmem:[%s1440_s1 + $0x50] sm:$0xff] (!%p138_p3)   ;;  %s926_s29 = sshll.u32 (!%p138_p3), %s1266_s9, 4 }
   0x7   : > { %141 = sbr.rel (%p138_p3) target bundleno = 319 (0x13f), region = 28  ;;  %v1197_v1 = vld [vmem:[%s1440_s1] sm:$0xff] (!%p138_p3)   ;;  %1059 = vmatprep.subr.bf16.mxu0 (!%p138_p3), %v1196_v0  ;;  %v1200_v4 = vld [vmem:[%s1440_s1 + $0x8] sm:$0xff] (!%p138_p3)   ;;  %v1203_v7 = vld [vmem:[%s1440_s1 + $0x10] sm:$0xff] (!%p138_p3)   ;;  %p168_p4 = scmp.lt.s32.totalorder (!%p138_p3), %s926_s29, 47 }
   0x8   : > { %v1198_v2 = vld [vmem:[%s1440_s1 + $0x80] sm:$0xff] (!%p138_p3)   ;;  %1060 = vmatpush3.bf16.msra.mxu0 (!%p138_p3), %v1197_v1  ;;  %v1201_v5 = vld [vmem:[%s1440_s1 + $0x88] sm:$0xff] (!%p138_p3)   ;;  %v1204_v8 = vld [vmem:[%s1440_s1 + $0x90] sm:$0xff] (!%p138_p3)  }
   0x9   : > { %1139 = vmatprep.subr.bf16.mxu1 (!%p138_p3), %v1198_v2  ;;  %1061 = vmatprep.subr.bf16.mxu0 (!%p138_p3), %v1199_v3  ;;  %v1205_v9 = vld [vmem:[%s1440_s1 + $0x58] sm:$0xff] (!%p138_p3)   ;;  %v1208_v12 = vld [vmem:[%s1440_s1 + $0x60] sm:$0xff] (!%p138_p3)   ;;  %v1211_v15 = vld [vmem:[%s1440_s1 + $0x68] sm:$0xff] (!%p138_p3)  }
   0xa   : > { %1140 = vmatpush3.bf16.msra.mxu1 (!%p138_p3), %v1198_v2  ;;  %v1206_v10 = vld [vmem:[%s1440_s1 + $0x18] sm:$0xff] (!%p138_p3)   ;;  %v1210_v13 = vld [vmem:[%s1440_s1 + $0xa0] sm:$0xff] (!%p138_p3)   ;;  %v1213_v16 = vld [vmem:[%s1440_s1 + $0xa8] sm:$0xff] (!%p138_p3)  }
   0xb   : > { %1141 = vmatprep.subr.bf16.mxu1 (!%p138_p3), %v1201_v5  ;;  %v1207_v11 = vld [vmem:[%s1440_s1 + $0x98] sm:$0xff] (!%p138_p3)   ;;  %v1209_v14 = vld [vmem:[%s1440_s1 + $0x20] sm:$0xff] (!%p138_p3)   ;;  %v1212_v17 = vld [vmem:[%s1440_s1 + $0x28] sm:$0xff] (!%p138_p3)  }
   0xc   : > { %1062 = vmatpush3.bf16.msra.mxu0 (!%p138_p3), %v1200_v4  ;;  %v1214_v18 = vld [vmem:[%s1440_s1 + $0x70] sm:$0xff] (!%p138_p3)   ;;  %v1217_v21 = vld [vmem:[%s1440_s1 + $0x78] sm:$0xff] (!%p138_p3)  }
   0xd   : > { %1063 = vmatprep.subr.bf16.mxu0 (!%p138_p3), %v1202_v6  ;;  %v1215_v19 = vld [vmem:[%s1440_s1 + $0x30] sm:$0xff] (!%p138_p3)   ;;  %v1219_v22 = vld [vmem:[%s1440_s1 + $0xb8] sm:$0xff] (!%p138_p3)  }
   0xe   : > { %1142 = vmatpush3.bf16.msra.mxu1 %v1201_v5  ;;  %s1447_s29 = smov (!%p168_p4, %s926_s29), 47  ;;  %v1216_v20 = vld [vmem:[%s1440_s1 + $0xb0] sm:$0xff]   ;;  %v1218_v25 = vld [vmem:[%s1440_s1 + $0x38] sm:$0xff]  }
   0xf   : > { %1143 = vmatprep.subr.bf16.mxu1 %v1204_v8  ;;  %s1171_s23 = smul.u32 12, %s1447_s29  ;;  %s929_s17 = sshll.u32 %s1447_s29, 2 }
  0x10   : > { %1064 = vmatpush3.bf16.msra.mxu0 %v1203_v7  ;;  %s1420_s20 = scalar_lea.vmem %s1441_s2, %s929_s17 }
  0x11   : > { %1065 = vmatprep.subr.bf16.mxu0 %v1205_v9  ;;  %s1381_s7 = scalar_lea.vmem %s1439_s0, %s1171_s23 }
  0x12   : > { %1144 = vmatpush3.bf16.msra.mxu1 %v1204_v8  ;;  %v1222_v23 = vld [vmem:[%s1381_s7 + $0x4] ss:$12 sps:$4 sm:$0xff]   ;;  %v1223_v24 = vld [vmem:[%s1381_s7 + $0x8] ss:$12 sps:$4 sm:$0xff]   ;;  %v1220_v26 = vld [vmem:[%s1381_s7] ss:$12 sps:$4 sm:$0xff]  }
  0x13   : > { %1145 = vmatprep.subr.bf16.mxu1 %v1207_v11  ;;  %572 = vmatprep.mubr.bf16.mxu0 %v1222_v23  ;;  %v1225_v27 = vld [vmem:[%s1381_s7 + $0x1c] ss:$12 sps:$4 sm:$0xff]   ;;  %v1224_v28 = vld [vmem:[%s1381_s7 + $0x20] ss:$12 sps:$4 sm:$0xff]   ;;  %v1231_v29 = vld [vmem:[%s1381_s7 + $0x38] ss:$12 sps:$4 sm:$0xff]  }
  0x14   : > { %1066 = vmatpush3.bf16.msra.mxu0 %v1206_v10  ;;  %1155 = vmatprep.mubr.bf16.mxu1 %v1223_v24  ;;  %v1227_v30 = vld [vmem:[%s1381_s7 + $0x18] ss:$12 sps:$4 sm:$0xff]   ;;  %v1228_v31 = vld [vmem:[%s1381_s7 + $0x34] ss:$12 sps:$4 sm:$0xff]   ;;  %v1232_v32 = vld [vmem:[%s1381_s7 + $0x50] ss:$12 sps:$4 sm:$0xff]  }
  0x15   : > { %1067 = vmatprep.subr.bf16.mxu0 %v1208_v12  ;;  %v1239_v33 = vld [vmem:[%s1381_s7 + $0x68] ss:$12 sps:$4 sm:$0xff]   ;;  %v1230_v34 = vld [vmem:[%s1381_s7 + $0x30] ss:$12 sps:$4 sm:$0xff]   ;;  %v1233_v35 = vld [vmem:[%s1381_s7 + $0x4c] ss:$12 sps:$4 sm:$0xff]  }
  0x16   : > { %1146 = vmatpush3.bf16.msra.mxu1 %v1207_v11  ;;  %v1240_v36 = vld [vmem:[%s1381_s7 + $0x80] ss:$12 sps:$4 sm:$0xff]   ;;  %v1247_v37 = vld [vmem:[%s1381_s7 + $0x98] ss:$12 sps:$4 sm:$0xff]   ;;  %v1235_v38 = vld [vmem:[%s1381_s7 + $0x48] ss:$12 sps:$4 sm:$0xff]  }
  0x17   : > { %1147 = vmatprep.subr.bf16.mxu1 %v1210_v13  ;;  %v1236_v39 = vld [vmem:[%s1381_s7 + $0x64] ss:$12 sps:$4 sm:$0xff]   ;;  %v1238_v41 = vld [vmem:[%s1381_s7 + $0x60] ss:$12 sps:$4 sm:$0xff]   ;;  %v1241_v42 = vld [vmem:[%s1381_s7 + $0x7c] ss:$12 sps:$4 sm:$0xff]  }
  0x18   : > { %1068 = vmatpush3.bf16.msra.mxu0 %v1209_v14  ;;  %v1248_v40 = vld [vmem:[%s1381_s7 + $0xb0] ss:$12 sps:$4 sm:$0xff]   ;;  %v1243_v43 = vld [vmem:[%s1381_s7 + $0x78] ss:$12 sps:$4 sm:$0xff]   ;;  %v1244_v44 = vld [vmem:[%s1381_s7 + $0x94] ss:$12 sps:$4 sm:$0xff]  }
  0x19   : > { %1069 = vmatprep.subr.bf16.mxu0 %v1211_v15  ;;  %v1246_v45 = vld [vmem:[%s1381_s7 + $0x90] ss:$12 sps:$4 sm:$0xff]   ;;  %v1249_v46 = vld [vmem:[%s1381_s7 + $0xac] ss:$12 sps:$4 sm:$0xff]   ;;  %v1251_v47 = vld [vmem:[%s1381_s7 + $0xa8] ss:$12 sps:$4 sm:$0xff]  }
  0x1a   : > { %1148 = vmatpush3.bf16.msra.mxu1 %v1210_v13 }
  0x1b   : > { %1149 = vmatprep.subr.bf16.mxu1 %v1213_v16 }
  0x1c   : > { %1070 = vmatpush3.bf16.msra.mxu0 %v1212_v17 }
  0x1d   : > { %1071 = vmatprep.subr.bf16.mxu0 %v1214_v18 }
  0x1e   : > { %1150 = vmatpush3.bf16.msra.mxu1 %v1213_v16 }
  0x1f   : > { %1151 = vmatprep.subr.bf16.mxu1 %v1216_v20 }
  0x20   : > { %1072 = vmatpush3.bf16.msra.mxu0 %v1215_v19 }
  0x21   : > { %1073 = vmatprep.subr.bf16.mxu0 %v1217_v21 }
  0x22   : > { %1152 = vmatpush3.bf16.msra.mxu1 %v1216_v20 }
  0x23   : > { %1153 = vmatprep.subr.bf16.mxu1 %v1219_v22 }
  0x24   : > { %1074 = vmatpush3.bf16.msra.mxu0 %v1218_v25 }
  0x26   : > { %1154 = vmatpush3.bf16.msra.mxu1 %v1219_v22 }
  0x27   : > { %573 = vmatmul.mubr.bf16.vlgmr.msra.gmra.mrb[0].mxu0 %v1220_v26 }
  0x28   : > { %580 = vmatprep.mubr.bf16.mxu0 %v1225_v27 }
  0x29   : > { %1156 = vmatmul.mubr.bf16.vlgmr.msra.gmra.mrb[0].mxu1 %v1224_v28 }
  0x2a   : > { %1159 = vmatprep.mubr.bf16.mxu1 %v1231_v29 }
  0x2f   : > { %581 = vmatmul.mubr.bf16.gmra.mrb[4].mxu0 %v1227_v30 }
  0x30   : > { %588 = vmatprep.mubr.bf16.mxu0 %v1228_v31 }
  0x31   : > { %1160 = vmatmul.mubr.bf16.gmra.mrb[4].mxu1 %v1232_v32 }
  0x32   : > { %1163 = vmatprep.mubr.bf16.mxu1 %v1239_v33 }
  0x37   : > { %589 = vmatmul.mubr.bf16.gmra.mrb[8].mxu0 %v1230_v34 }
  0x38   : > { %596 = vmatprep.mubr.bf16.mxu0 %v1233_v35 }
  0x39   : > { %1164 = vmatmul.mubr.bf16.gmra.mrb[8].mxu1 %v1240_v36 }
  0x3a   : > { %1167 = vmatprep.mubr.bf16.mxu1 %v1247_v37 }
  0x3f   : > { %597 = vmatmul.mubr.bf16.gmra.mrb[12].mxu0 %v1235_v38 }
  0x40   : > { %604 = vmatprep.mubr.bf16.mxu0 %v1236_v39 }
  0x41   : > { %1168 = vmatmul.mubr.bf16.gmra.mrb[12].mxu1 %v1248_v40 }
  0x47   : > { %605 = vmatmul.mubr.bf16.gmra.mrb[16].mxu0 %v1238_v41 }
  0x48   : > { %612 = vmatprep.mubr.bf16.mxu0 %v1241_v42 }
  0x4f   : > { %613 = vmatmul.mubr.bf16.gmra.mrb[20].mxu0 %v1243_v43 }
  0x50   : > { %620 = vmatprep.mubr.bf16.mxu0 %v1244_v44 }
  0x57   : > { %621 = vmatmul.mubr.bf16.gmra.mrb[24].mxu0 %v1246_v45 }
  0x58   : > { %628 = vmatprep.mubr.bf16.mxu0 %v1249_v46 }
  0x5f   : > { %629 = vmatmul.mubr.bf16.gmra.mrb[28].mxu0 %v1251_v47 }
  0xfa   : > { %v1075_v48 = vpop.f32.mrb[0].mxu0 }
  0xfb   : > { %v1076_v49 = vpop.f32.mrb[1].mxu0 }
  0xfc   : > { %v1077_v50 = vadd.f32 %v1076_v49, %v1075_v48  ;;  %v1078_v51 = vpop.f32.mrb[2].mxu0  ;;  %v1157_v52 = vpop.f32.mrb[0].mxu1 }
  0xfd   : > { %v1079_v53 = vpop.f32.mrb[3].mxu0  ;;  %v671_v54 = vpop.f32.mrb[1].mxu1 }
  0xfe   : > { %v1080_v55 = vadd.f32 %v1079_v53, %v1078_v51  ;;  %v672_v56 = vadd.f32 %v1077_v50, %v671_v54  ;;  %v1158_v57 = vpop.f32.mrb[2].mxu1 }
  0xff   : > { %v674_v58 = vpop.f32.mrb[3].mxu1 }
 0x100   : > { %v675_v59 = vadd.f32 %v1080_v55, %v674_v58  ;;  %v734_v60 = vmax.f32 %v672_v56, 0.0 }
 0x102   : > { %v735_v61 = vmax.f32 %v675_v59, 0.0  ;;  %v1081_v62 = vpop.f32.mrb[4].mxu0 }
 0x103   : > { %v1082_v63 = vpop.f32.mrb[5].mxu0 }
 0x104   : > { %v1015_v0 = vpack.c.bf16 %v735_v61, %v734_v60  ;;  %v1083_v1 = vadd.f32 %v1082_v63, %v1081_v62  ;;  %v1084_v2 = vpop.f32.mrb[6].mxu0  ;;  %v1161_v3 = vpop.f32.mrb[4].mxu1 }
 0x105   : > { %v1085_v4 = vpop.f32.mrb[7].mxu0  ;;  %v687_v5 = vpop.f32.mrb[5].mxu1 }
 0x106   : > { %1016 = vst [vmem:[%s1420_s20] sm:$0xff] %v1015_v0   ;;  %v680_v6 = vadd.f32 %v1157_v52, %v1083_v1  ;;  %v1086_v7 = vadd.f32 %v1085_v4, %v1084_v2  ;;  %v1162_v8 = vpop.f32.mrb[6].mxu1 }
 0x107   : > { %v690_v9 = vpop.f32.mrb[7].mxu1 }
 0x108   : > { %v683_v10 = vadd.f32 %v1158_v57, %v1086_v7  ;;  %v736_v11 = vmax.f32 %v680_v6, 0.0 }
 0x10a   : > { %v737_v12 = vmax.f32 %v683_v10, 0.0  ;;  %v1087_v13 = vpop.f32.mrb[8].mxu0 }
 0x10b   : > { %v1088_v14 = vpop.f32.mrb[9].mxu0 }
 0x10c   : > { %v1020_v15 = vpack.c.bf16 %v737_v12, %v736_v11  ;;  %v1089_v16 = vadd.f32 %v1088_v14, %v1087_v13  ;;  %v1090_v17 = vpop.f32.mrb[10].mxu0  ;;  %v1165_v18 = vpop.f32.mrb[8].mxu1 }
 0x10d   : > { %v1091_v19 = vpop.f32.mrb[11].mxu0  ;;  %v703_v20 = vpop.f32.mrb[9].mxu1 }
 0x10e   : > { %1052 = vst [vmem:[%s1420_s20 + $0x8] sm:$0xff] %v1020_v15   ;;  %v1092_v21 = vadd.f32 %v1091_v19, %v1090_v17  ;;  %v688_v22 = vadd.f32 %v1089_v16, %v687_v5  ;;  %v1166_v23 = vpop.f32.mrb[10].mxu1 }
 0x10f   : > { %v706_v24 = vpop.f32.mrb[11].mxu1 }
 0x110   : > { %v691_v25 = vadd.f32 %v1092_v21, %v690_v9  ;;  %v738_v26 = vmax.f32 %v688_v22, 0.0 }
 0x112   : > { %v739_v27 = vmax.f32 %v691_v25, 0.0  ;;  %v1093_v28 = vpop.f32.mrb[12].mxu0 }
 0x113   : > { %v1094_v29 = vpop.f32.mrb[13].mxu0 }
 0x114   : > { %v1025_v30 = vpack.c.bf16 %v739_v27, %v738_v26  ;;  %v1095_v31 = vadd.f32 %v1094_v29, %v1093_v28  ;;  %v1096_v32 = vpop.f32.mrb[14].mxu0  ;;  %v1169_v33 = vpop.f32.mrb[12].mxu1 }
 0x115   : > { %v1097_v34 = vpop.f32.mrb[15].mxu0  ;;  %v719_v35 = vpop.f32.mrb[13].mxu1 }
 0x116   : > { %1053 = vst [vmem:[%s1420_s20 + $0x10] sm:$0xff] %v1025_v30   ;;  %v696_v36 = vadd.f32 %v1161_v3, %v1095_v31  ;;  %v1098_v37 = vadd.f32 %v1097_v34, %v1096_v32  ;;  %v1170_v38 = vpop.f32.mrb[14].mxu1 }
 0x117   : > { %v722_v39 = vpop.f32.mrb[15].mxu1 }
 0x118   : > { %v699_v40 = vadd.f32 %v1162_v8, %v1098_v37  ;;  %v740_v41 = vmax.f32 %v696_v36, 0.0 }
 0x11a   : > { %v741_v42 = vmax.f32 %v699_v40, 0.0  ;;  %v1099_v43 = vpop.f32.mrb[16].mxu0 }
 0x11b   : > { %v1100_v44 = vpop.f32.mrb[17].mxu0 }
 0x11c   : > { %v1030_v45 = vpack.c.bf16 %v741_v42, %v740_v41  ;;  %v1101_v46 = vadd.f32 %v1100_v44, %v1099_v43  ;;  %v1102_v47 = vpop.f32.mrb[18].mxu0 }
 0x11d   : > { %v1103_v48 = vpop.f32.mrb[19].mxu0 }
 0x11e   : > { %1054 = vst [vmem:[%s1420_s20 + $0x18] sm:$0xff] %v1030_v45   ;;  %v1104_v49 = vadd.f32 %v1103_v48, %v1102_v47  ;;  %v704_v50 = vadd.f32 %v1101_v46, %v703_v20 }
 0x120   : > { %v707_v51 = vadd.f32 %v1104_v49, %v706_v24  ;;  %v742_v52 = vmax.f32 %v704_v50, 0.0 }
 0x122   : > { %v743_v53 = vmax.f32 %v707_v51, 0.0  ;;  %v1105_v54 = vpop.f32.mrb[20].mxu0 }
 0x123   : > { %v1106_v55 = vpop.f32.mrb[21].mxu0 }
 0x124   : > { %v1035_v56 = vpack.c.bf16 %v743_v53, %v742_v52  ;;  %v1107_v57 = vadd.f32 %v1106_v55, %v1105_v54  ;;  %v1108_v58 = vpop.f32.mrb[22].mxu0 }
 0x125   : > { %v1109_v59 = vpop.f32.mrb[23].mxu0 }
 0x126   : > { %1055 = vst [vmem:[%s1420_s20 + $0x20] sm:$0xff] %v1035_v56   ;;  %v712_v60 = vadd.f32 %v1165_v18, %v1107_v57  ;;  %v1110_v61 = vadd.f32 %v1109_v59, %v1108_v58 }
 0x128   : > { %v715_v62 = vadd.f32 %v1166_v23, %v1110_v61  ;;  %v744_v63 = vmax.f32 %v712_v60, 0.0 }
 0x12a   : > { %v745_v0 = vmax.f32 %v715_v62, 0.0  ;;  %v1111_v1 = vpop.f32.mrb[24].mxu0 }
 0x12b   : > { %v1112_v2 = vpop.f32.mrb[25].mxu0 }
 0x12c   : > { %v1040_v3 = vpack.c.bf16 %v745_v0, %v744_v63  ;;  %v1113_v4 = vadd.f32 %v1112_v2, %v1111_v1  ;;  %v1114_v5 = vpop.f32.mrb[26].mxu0 }
 0x12d   : > { %v1115_v6 = vpop.f32.mrb[27].mxu0 }
 0x12e   : > { %1056 = vst [vmem:[%s1420_s20 + $0x28] sm:$0xff] %v1040_v3   ;;  %v1116_v7 = vadd.f32 %v1115_v6, %v1114_v5  ;;  %v720_v8 = vadd.f32 %v1113_v4, %v719_v35 }
 0x130   : > { %v723_v9 = vadd.f32 %v1116_v7, %v722_v39  ;;  %v746_v10 = vmax.f32 %v720_v8, 0.0 }
 0x132   : > { %v747_v11 = vmax.f32 %v723_v9, 0.0  ;;  %v1117_v12 = vpop.f32.mrb[28].mxu0 }
 0x133   : > { %v1118_v13 = vpop.f32.mrb[29].mxu0 }
 0x134   : > { %v1045_v14 = vpack.c.bf16 %v747_v11, %v746_v10  ;;  %v1119_v15 = vadd.f32 %v1118_v13, %v1117_v12  ;;  %v1120_v16 = vpop.f32.mrb[30].mxu0 }
 0x135   : > { %v1121_v17 = vpop.f32.mrb[31].mxu0 }
 0x136   : > { %1057 = vst [vmem:[%s1420_s20 + $0x30] sm:$0xff] %v1045_v14   ;;  %v728_v18 = vadd.f32 %v1169_v33, %v1119_v15  ;;  %v1122_v19 = vadd.f32 %v1121_v17, %v1120_v16 }
 0x138   : > { %v731_v20 = vadd.f32 %v1170_v38, %v1122_v19  ;;  %v748_v21 = vmax.f32 %v728_v18, 0.0 }
 0x13a   : > { %v749_v22 = vmax.f32 %v731_v20, 0.0 }
 0x13c   : > { %v1050_v23 = vpack.c.bf16 %v749_v22, %v748_v21 }
 0x13e   : > { %1058 = vst [vmem:[%s1420_s20 + $0x38] sm:$0xff] %v1050_v23  }
 0x13f PF: > { %s12_s11 = sadd.s32 1, %s1274_s11   ;;  %s1442_s9 = smov %s1270_s10 }
 0x140   : > { %p9_p5 = scmp.ge.s32.totalorder %s12_s11, 5   ;;  %s1443_s10 = smov %s1445_s12 }
 0x142   :  { %11 = sbr.rel (!%p9_p5) target bundleno = 2 (0x2), region = 61 }

// kernel: _forward_impl.8
= control target key start
LH: loop header
LB: loop body
LE: loop exit
PB: predicated region body
PF: predicated region fallthrough
CT: control target
= control target key end

     0   :  { %s551_s1 = inlined_call_operand.vmem [shape: bf16[256,128], index: 1, kind: input, shape index: {}]   ;;  %s552_s0 = inlined_call_operand.vmem [shape: bf16[64,256], index: 0, kind: input, shape index: {}]   ;;  %s553_s2 = inlined_call_operand.vmem [shape: bf16[64,128], index: 2, kind: output, shape index: {}]  }
   0x1   :  { %v424_v0 = vld [vmem:[%s551_s1 + $0x40] sm:$0xff]   ;;  %v426_v2 = vld [vmem:[%s551_s1 + $0x48] sm:$0xff]   ;;  %v428_v4 = vld [vmem:[%s551_s1 + $0x50] sm:$0xff]  }
   0x2   :  { %v425_v1 = vld [vmem:[%s551_s1] sm:$0xff]   ;;  %368 = vmatprep.subr.bf16.mxu0 %v424_v0  ;;  %408 = vmatprep.subr.bf16.mxu1 %v424_v0  ;;  %v427_v3 = vld [vmem:[%s551_s1 + $0x8] sm:$0xff]   ;;  %v429_v5 = vld [vmem:[%s551_s1 + $0x10] sm:$0xff]  }
   0x3   :  { %369 = vmatpush3.bf16.msra.mxu0 %v425_v1  ;;  %416 = vmatpush3.bf16.msra.mxu1 %v425_v1  ;;  %v430_v6 = vld [vmem:[%s551_s1 + $0x58] sm:$0xff]   ;;  %v432_v8 = vld [vmem:[%s551_s1 + $0x60] sm:$0xff]   ;;  %v434_v10 = vld [vmem:[%s551_s1 + $0x68] sm:$0xff]  }
   0x4   :  { %370 = vmatprep.subr.bf16.mxu0 %v426_v2  ;;  %409 = vmatprep.subr.bf16.mxu1 %v426_v2  ;;  %v431_v7 = vld [vmem:[%s551_s1 + $0x18] sm:$0xff]   ;;  %v433_v9 = vld [vmem:[%s551_s1 + $0x20] sm:$0xff]   ;;  %v435_v13 = vld [vmem:[%s551_s1 + $0x28] sm:$0xff]  }
   0x5   :  { %v442_v11 = vld [vmem:[%s552_s0 + $0x4] ss:$8 sps:$4 sm:$0xff]   ;;  %v436_v14 = vld [vmem:[%s551_s1 + $0x70] sm:$0xff]   ;;  %v438_v16 = vld [vmem:[%s551_s1 + $0x78] sm:$0xff]  }
   0x6   :  { %v445_v12 = vld [vmem:[%s552_s0 + $0x24] ss:$8 sps:$4 sm:$0xff]   ;;  %220 = vmatprep.mubr.bf16.mxu0 %v442_v11  ;;  %v437_v15 = vld [vmem:[%s551_s1 + $0x30] sm:$0xff]   ;;  %v439_v17 = vld [vmem:[%s551_s1 + $0x38] sm:$0xff]  }
   0x7   :  { %371 = vmatpush3.bf16.msra.mxu0 %v427_v3  ;;  %417 = vmatpush3.bf16.msra.mxu1 %v427_v3  ;;  %v440_v18 = vld [vmem:[%s552_s0] ss:$8 sps:$4 sm:$0xff]   ;;  %v446_v20 = vld [vmem:[%s552_s0 + $0x14] ss:$8 sps:$4 sm:$0xff]   ;;  %v450_v22 = vld [vmem:[%s552_s0 + $0x10] ss:$8 sps:$4 sm:$0xff]  }
   0x8   :  { %372 = vmatprep.subr.bf16.mxu0 %v428_v4  ;;  %410 = vmatprep.subr.bf16.mxu1 %v428_v4  ;;  %v443_v19 = vld [vmem:[%s552_s0 + $0x20] ss:$8 sps:$4 sm:$0xff]   ;;  %v448_v21 = vld [vmem:[%s552_s0 + $0x34] ss:$8 sps:$4 sm:$0xff]   ;;  %v451_v23 = vld [vmem:[%s552_s0 + $0x30] ss:$8 sps:$4 sm:$0xff]  }
   0x9   :  { %236 = vmatprep.mubr.bf16.mxu1 %v445_v12 }
   0xb   :  { %373 = vmatpush3.bf16.msra.mxu0 %v429_v5  ;;  %418 = vmatpush3.bf16.msra.mxu1 %v429_v5 }
   0xc   :  { %374 = vmatprep.subr.bf16.mxu0 %v430_v6  ;;  %411 = vmatprep.subr.bf16.mxu1 %v430_v6 }
   0xf   :  { %375 = vmatpush3.bf16.msra.mxu0 %v431_v7  ;;  %419 = vmatpush3.bf16.msra.mxu1 %v431_v7 }
  0x10   :  { %376 = vmatprep.subr.bf16.mxu0 %v432_v8  ;;  %412 = vmatprep.subr.bf16.mxu1 %v432_v8 }
  0x13   :  { %377 = vmatpush3.bf16.msra.mxu0 %v433_v9  ;;  %420 = vmatpush3.bf16.msra.mxu1 %v433_v9 }
  0x14   :  { %378 = vmatprep.subr.bf16.mxu0 %v434_v10  ;;  %413 = vmatprep.subr.bf16.mxu1 %v434_v10 }
  0x17   :  { %379 = vmatpush3.bf16.msra.mxu0 %v435_v13  ;;  %421 = vmatpush3.bf16.msra.mxu1 %v435_v13 }
  0x18   :  { %380 = vmatprep.subr.bf16.mxu0 %v436_v14  ;;  %414 = vmatprep.subr.bf16.mxu1 %v436_v14 }
  0x1b   :  { %381 = vmatpush3.bf16.msra.mxu0 %v437_v15  ;;  %422 = vmatpush3.bf16.msra.mxu1 %v437_v15 }
  0x1c   :  { %382 = vmatprep.subr.bf16.mxu0 %v438_v16  ;;  %415 = vmatprep.subr.bf16.mxu1 %v438_v16 }
  0x1f   :  { %383 = vmatpush3.bf16.msra.mxu0 %v439_v17  ;;  %423 = vmatpush3.bf16.msra.mxu1 %v439_v17 }
  0x22   :  { %221 = vmatmul.mubr.bf16.vlgmr.msra.gmra.mrb[0].mxu0 %v440_v18  ;;  %237 = vmatmul.mubr.bf16.vlgmr.msra.gmra.mrb[0].mxu1 %v443_v19 }
  0x23   :  { %228 = vmatprep.mubr.bf16.mxu0 %v446_v20  ;;  %244 = vmatprep.mubr.bf16.mxu1 %v448_v21 }
  0x2a   :  { %229 = vmatmul.mubr.bf16.gmra.mrb[4].mxu0 %v450_v22  ;;  %245 = vmatmul.mubr.bf16.gmra.mrb[4].mxu1 %v451_v23 }
  0xf5   :  { %v384_v24 = vpop.f32.mrb[0].mxu0  ;;  %v396_v25 = vpop.f32.mrb[0].mxu1 }
  0xf6   :  { %v385_v26 = vpop.f32.mrb[1].mxu0  ;;  %v397_v27 = vpop.f32.mrb[1].mxu1 }
  0xf7   :  { %v386_v28 = vadd.f32 %v385_v26, %v384_v24  ;;  %v398_v29 = vadd.f32 %v397_v27, %v396_v25  ;;  %v387_v30 = vpop.f32.mrb[2].mxu0  ;;  %v399_v31 = vpop.f32.mrb[2].mxu1 }
  0xf8   :  { %v388_v32 = vpop.f32.mrb[3].mxu0  ;;  %v400_v33 = vpop.f32.mrb[3].mxu1 }
  0xf9   :  { %v389_v34 = vadd.f32 %v388_v32, %v387_v30  ;;  %v401_v35 = vadd.f32 %v400_v33, %v399_v31  ;;  %v253_v36 = vmax.f32 %v386_v28, 0.0  ;;  %v257_v37 = vmax.f32 %v398_v29, 0.0 }
  0xfb   :  { %v254_v38 = vmax.f32 %v389_v34, 0.0  ;;  %v258_v39 = vmax.f32 %v401_v35, 0.0 }
  0xfd   :  { %v348_v40 = vpack.c.bf16 %v254_v38, %v253_v36  ;;  %v358_v41 = vpack.c.bf16 %v258_v39, %v257_v37  ;;  %v390_v42 = vpop.f32.mrb[4].mxu0  ;;  %v402_v43 = vpop.f32.mrb[4].mxu1 }
  0xfe   :  { %v391_v44 = vpop.f32.mrb[5].mxu0  ;;  %v403_v45 = vpop.f32.mrb[5].mxu1 }
  0xff   :  { %349 = vst [vmem:[%s553_s2] sm:$0xff] %v348_v40   ;;  %366 = vst [vmem:[%s553_s2 + $0x10] sm:$0xff] %v358_v41   ;;  %v392_v46 = vadd.f32 %v391_v44, %v390_v42  ;;  %v404_v47 = vadd.f32 %v403_v45, %v402_v43  ;;  %v393_v48 = vpop.f32.mrb[6].mxu0  ;;  %v405_v49 = vpop.f32.mrb[6].mxu1 }
 0x100   :  { %v394_v50 = vpop.f32.mrb[7].mxu0  ;;  %v406_v51 = vpop.f32.mrb[7].mxu1 }
 0x101   :  { %v395_v52 = vadd.f32 %v394_v50, %v393_v48  ;;  %v407_v53 = vadd.f32 %v406_v51, %v405_v49  ;;  %v255_v54 = vmax.f32 %v392_v46, 0.0  ;;  %v259_v55 = vmax.f32 %v404_v47, 0.0 }
 0x103   :  { %v256_v56 = vmax.f32 %v395_v52, 0.0  ;;  %v260_v57 = vmax.f32 %v407_v53, 0.0 }
 0x105   :  { %v353_v58 = vpack.c.bf16 %v256_v56, %v255_v54  ;;  %v363_v59 = vpack.c.bf16 %v260_v57, %v259_v55 }
 0x107   :  { %365 = vst [vmem:[%s553_s2 + $0x8] sm:$0xff] %v353_v58   ;;  %367 = vst [vmem:[%s553_s2 + $0x18] sm:$0xff] %v363_v59  }

// kernel: _forward_impl.10
= control target key start
LH: loop header
LB: loop body
LE: loop exit
PB: predicated region body
PF: predicated region fallthrough
CT: control target
= control target key end

     0   :  { %s492_s1 = inlined_call_operand.vmem [shape: bf16[256,256], index: 1, kind: input, shape index: {}]   ;;  %s493_s0 = inlined_call_operand.vmem [shape: bf16[16,256], index: 0, kind: input, shape index: {}]   ;;  %s494_s2 = inlined_call_operand.vmem [shape: bf16[16,256], index: 2, kind: output, shape index: {}]  }
   0x1   :  { %v318_v0 = vld [vmem:[%s492_s1 + $0x4] ss:$8 sps:$4 sm:$0xff]   ;;  %v320_v1 = vld [vmem:[%s492_s1] ss:$8 sps:$4 sm:$0xff]   ;;  %v321_v2 = vld [vmem:[%s492_s1 + $0x14] ss:$8 sps:$4 sm:$0xff]  }
   0x2   :  { %215 = vmatprep.subr.bf16.mxu0 %v318_v0  ;;  %v323_v3 = vld [vmem:[%s492_s1 + $0x10] ss:$8 sps:$4 sm:$0xff]   ;;  %v324_v4 = vld [vmem:[%s492_s1 + $0x24] ss:$8 sps:$4 sm:$0xff]   ;;  %v326_v5 = vld [vmem:[%s492_s1 + $0x20] ss:$8 sps:$4 sm:$0xff]  }
   0x3   :  { %216 = vmatpush1.bf16.msra.mxu0 %v320_v1  ;;  %v327_v6 = vld [vmem:[%s492_s1 + $0x34] ss:$8 sps:$4 sm:$0xff]   ;;  %v329_v7 = vld [vmem:[%s492_s1 + $0x30] ss:$8 sps:$4 sm:$0xff]   ;;  %v330_v8 = vld [vmem:[%s492_s1 + $0x44] ss:$8 sps:$4 sm:$0xff]  }
   0x4   :  { %217 = vmatprep.subr.bf16.mxu0 %v321_v2  ;;  %v332_v9 = vld [vmem:[%s492_s1 + $0x40] ss:$8 sps:$4 sm:$0xff]   ;;  %v333_v10 = vld [vmem:[%s492_s1 + $0x54] ss:$8 sps:$4 sm:$0xff]   ;;  %v335_v11 = vld [vmem:[%s492_s1 + $0x50] ss:$8 sps:$4 sm:$0xff]  }
   0x5   :  { %v336_v12 = vld [vmem:[%s492_s1 + $0x64] ss:$8 sps:$4 sm:$0xff]   ;;  %v338_v14 = vld [vmem:[%s492_s1 + $0x60] ss:$8 sps:$4 sm:$0xff]   ;;  %v339_v15 = vld [vmem:[%s492_s1 + $0x74] ss:$8 sps:$4 sm:$0xff]  }
   0x6   :  { %v368_v13 = vld [vmem:[%s493_s0 + $0x4] ss:$8 sps:$4 sm:$0xff]   ;;  %v341_v16 = vld [vmem:[%s492_s1 + $0x70] ss:$8 sps:$4 sm:$0xff]   ;;  %v344_v18 = vld [vmem:[%s492_s1 + $0x80] ss:$8 sps:$4 sm:$0xff]  }
   0x7   :  { %218 = vmatpush1.bf16.msra.mxu0 %v323_v3  ;;  %247 = vmatprep.mubr.bf16.mxu0 %v368_v13  ;;  %v342_v17 = vld [vmem:[%s492_s1 + $0x84] ss:$8 sps:$4 sm:$0xff]   ;;  %v345_v19 = vld [vmem:[%s492_s1 + $0x94] ss:$8 sps:$4 sm:$0xff]   ;;  %v347_v20 = vld [vmem:[%s492_s1 + $0x90] ss:$8 sps:$4 sm:$0xff]  }
   0x8   :  { %219 = vmatprep.subr.bf16.mxu0 %v324_v4  ;;  %v348_v21 = vld [vmem:[%s492_s1 + $0xa4] ss:$8 sps:$4 sm:$0xff]   ;;  %v350_v22 = vld [vmem:[%s492_s1 + $0xa0] ss:$8 sps:$4 sm:$0xff]   ;;  %v351_v23 = vld [vmem:[%s492_s1 + $0xb4] ss:$8 sps:$4 sm:$0xff]  }
   0x9   :  { %v353_v24 = vld [vmem:[%s492_s1 + $0xb0] ss:$8 sps:$4 sm:$0xff]   ;;  %v354_v25 = vld [vmem:[%s492_s1 + $0xc4] ss:$8 sps:$4 sm:$0xff]   ;;  %v356_v26 = vld [vmem:[%s492_s1 + $0xc0] ss:$8 sps:$4 sm:$0xff]  }
   0xa   :  { %v357_v27 = vld [vmem:[%s492_s1 + $0xd4] ss:$8 sps:$4 sm:$0xff]   ;;  %v359_v28 = vld [vmem:[%s492_s1 + $0xd0] ss:$8 sps:$4 sm:$0xff]   ;;  %v360_v29 = vld [vmem:[%s492_s1 + $0xe4] ss:$8 sps:$4 sm:$0xff]  }
   0xb   :  { %220 = vmatpush1.bf16.msra.mxu0 %v326_v5  ;;  %v362_v30 = vld [vmem:[%s492_s1 + $0xe0] ss:$8 sps:$4 sm:$0xff]   ;;  %v363_v31 = vld [vmem:[%s492_s1 + $0xf4] ss:$8 sps:$4 sm:$0xff]   ;;  %v365_v32 = vld [vmem:[%s492_s1 + $0xf0] ss:$8 sps:$4 sm:$0xff]  }
   0xc   :  { %221 = vmatprep.subr.bf16.mxu0 %v327_v6  ;;  %v366_v33 = vld [vmem:[%s493_s0] ss:$8 sps:$4 sm:$0xff]  }
   0xf   :  { %222 = vmatpush1.bf16.msra.mxu0 %v329_v7 }
  0x10   :  { %223 = vmatprep.subr.bf16.mxu0 %v330_v8 }
  0x13   :  { %224 = vmatpush1.bf16.msra.mxu0 %v332_v9 }
  0x14   :  { %225 = vmatprep.subr.bf16.mxu0 %v333_v10 }
  0x17   :  { %226 = vmatpush1.bf16.msra.mxu0 %v335_v11 }
  0x18   :  { %227 = vmatprep.subr.bf16.mxu0 %v336_v12 }
  0x1b   :  { %228 = vmatpush1.bf16.msra.mxu0 %v338_v14 }
  0x1c   :  { %229 = vmatprep.subr.bf16.mxu0 %v339_v15 }
  0x1f   :  { %230 = vmatpush1.bf16.msra.mxu0 %v341_v16 }
  0x20   :  { %231 = vmatprep.subr.bf16.mxu0 %v342_v17 }
  0x23   :  { %232 = vmatpush1.bf16.msra.mxu0 %v344_v18 }
  0x24   :  { %233 = vmatprep.subr.bf16.mxu0 %v345_v19 }
  0x27   :  { %234 = vmatpush1.bf16.msra.mxu0 %v347_v20 }
  0x28   :  { %235 = vmatprep.subr.bf16.mxu0 %v348_v21 }
  0x2b   :  { %236 = vmatpush1.bf16.msra.mxu0 %v350_v22 }
  0x2c   :  { %237 = vmatprep.subr.bf16.mxu0 %v351_v23 }
  0x2f   :  { %238 = vmatpush1.bf16.msra.mxu0 %v353_v24 }
  0x30   :  { %239 = vmatprep.subr.bf16.mxu0 %v354_v25 }
  0x33   :  { %240 = vmatpush1.bf16.msra.mxu0 %v356_v26 }
  0x34   :  { %241 = vmatprep.subr.bf16.mxu0 %v357_v27 }
  0x37   :  { %242 = vmatpush1.bf16.msra.mxu0 %v359_v28 }
  0x38   :  { %243 = vmatprep.subr.bf16.mxu0 %v360_v29 }
  0x3b   :  { %244 = vmatpush1.bf16.msra.mxu0 %v362_v30 }
  0x3c   :  { %245 = vmatprep.subr.bf16.mxu0 %v363_v31 }
  0x3f   :  { %246 = vmatpush1.bf16.msra.mxu0 %v365_v32 }
  0x42   :  { %248 = vmatmul.mubr.bf16.vlgmr.msra.gmra.mrb[0].mxu0 %v366_v33 }
 0x115   :  { %v249_v34 = vpop.f32.mrb[0].mxu0 }
 0x116   :  { %v258_v35 = vmax.f32 %v249_v34, 0.0  ;;  %v251_v36 = vpop.f32.mrb[1].mxu0 }
 0x117   :  { %v259_v37 = vmax.f32 %v251_v36, 0.0  ;;  %v253_v38 = vpop.f32.mrb[2].mxu0 }
 0x118   :  { %v260_v39 = vmax.f32 %v253_v38, 0.0  ;;  %v255_v40 = vpop.f32.mrb[3].mxu0 }
 0x119   :  { %v316_v41 = vpack.c.bf16 %v259_v37, %v258_v35  ;;  %v261_v42 = vmax.f32 %v255_v40, 0.0 }
 0x11b   :  { %274 = vst [vmem:[%s494_s2] sm:$0xff] %v316_v41  ;;  %v317_v43 = vpack.c.bf16 %v261_v42, %v260_v39 }
 0x11d   :  { %275 = vst [vmem:[%s494_s2 + $0x8] sm:$0xff] %v317_v43 }

// kernel: _forward_impl.9
= control target key start
LH: loop header
LB: loop body
LE: loop exit
PB: predicated region body
PF: predicated region fallthrough
CT: control target
= control target key end

     0   :  { %s930_s1 = inlined_call_operand.vmem [shape: bf16[512,256], index: 1, kind: input, shape index: {}]   ;;  %s931_s0 = inlined_call_operand.vmem [shape: bf16[16,512], index: 0, kind: input, shape index: {}]   ;;  %s932_s2 = inlined_call_operand.vmem [shape: bf16[16,256], index: 2, kind: output, shape index: {}]  }
   0x1   :  { %v603_v0 = vld [vmem:[%s930_s1 + $0x4] ss:$8 sps:$4 sm:$0xff]   ;;  %v607_v2 = vld [vmem:[%s930_s1] ss:$8 sps:$4 sm:$0xff]   ;;  %v609_v4 = vld [vmem:[%s930_s1 + $0x14] ss:$8 sps:$4 sm:$0xff]  }
   0x2   :  { %v605_v1 = vld [vmem:[%s930_s1 + $0x104] ss:$8 sps:$4 sm:$0xff]   ;;  %419 = vmatprep.subr.bf16.mxu1 %v603_v0  ;;  %v608_v3 = vld [vmem:[%s930_s1 + $0x100] ss:$8 sps:$4 sm:$0xff]   ;;  %v611_v5 = vld [vmem:[%s930_s1 + $0x114] ss:$8 sps:$4 sm:$0xff]  }
   0x3   :  { %462 = vmatprep.subr.bf16.mxu0 %v605_v1  ;;  %420 = vmatpush1.bf16.msra.mxu1 %v607_v2  ;;  %v613_v6 = vld [vmem:[%s930_s1 + $0x10] ss:$8 sps:$4 sm:$0xff]   ;;  %v615_v8 = vld [vmem:[%s930_s1 + $0x24] ss:$8 sps:$4 sm:$0xff]   ;;  %v619_v10 = vld [vmem:[%s930_s1 + $0x20] ss:$8 sps:$4 sm:$0xff]  }
   0x4   :  { %463 = vmatpush1.bf16.msra.mxu0 %v608_v3  ;;  %421 = vmatprep.subr.bf16.mxu1 %v609_v4  ;;  %v614_v7 = vld [vmem:[%s930_s1 + $0x110] ss:$8 sps:$4 sm:$0xff]   ;;  %v617_v9 = vld [vmem:[%s930_s1 + $0x124] ss:$8 sps:$4 sm:$0xff]   ;;  %v620_v11 = vld [vmem:[%s930_s1 + $0x120] ss:$8 sps:$4 sm:$0xff]  }
   0x5   :  { %464 = vmatprep.subr.bf16.mxu0 %v611_v5  ;;  %v621_v12 = vld [vmem:[%s930_s1 + $0x34] ss:$8 sps:$4 sm:$0xff]   ;;  %v625_v14 = vld [vmem:[%s930_s1 + $0x30] ss:$8 sps:$4 sm:$0xff]   ;;  %v627_v16 = vld [vmem:[%s930_s1 + $0x44] ss:$8 sps:$4 sm:$0xff]  }
   0x6   :  { %v623_v13 = vld [vmem:[%s930_s1 + $0x134] ss:$8 sps:$4 sm:$0xff]   ;;  %v626_v15 = vld [vmem:[%s930_s1 + $0x130] ss:$8 sps:$4 sm:$0xff]   ;;  %v629_v17 = vld [vmem:[%s930_s1 + $0x144] ss:$8 sps:$4 sm:$0xff]  }
   0x7   :  { %422 = vmatpush1.bf16.msra.mxu1 %v613_v6  ;;  %v631_v18 = vld [vmem:[%s930_s1 + $0x40] ss:$8 sps:$4 sm:$0xff]   ;;  %v633_v20 = vld [vmem:[%s930_s1 + $0x54] ss:$8 sps:$4 sm:$0xff]   ;;  %v637_v22 = vld [vmem:[%s930_s1 + $0x50] ss:$8 sps:$4 sm:$0xff]  }
   0x8   :  { %465 = vmatpush1.bf16.msra.mxu0 %v614_v7  ;;  %423 = vmatprep.subr.bf16.mxu1 %v615_v8  ;;  %v632_v19 = vld [vmem:[%s930_s1 + $0x140] ss:$8 sps:$4 sm:$0xff]   ;;  %v635_v21 = vld [vmem:[%s930_s1 + $0x154] ss:$8 sps:$4 sm:$0xff]   ;;  %v638_v23 = vld [vmem:[%s930_s1 + $0x150] ss:$8 sps:$4 sm:$0xff]  }
   0x9   :  { %466 = vmatprep.subr.bf16.mxu0 %v617_v9  ;;  %v639_v24 = vld [vmem:[%s930_s1 + $0x64] ss:$8 sps:$4 sm:$0xff]   ;;  %v643_v26 = vld [vmem:[%s930_s1 + $0x60] ss:$8 sps:$4 sm:$0xff]   ;;  %v645_v28 = vld [vmem:[%s930_s1 + $0x74] ss:$8 sps:$4 sm:$0xff]  }
   0xa   :  { %v641_v25 = vld [vmem:[%s930_s1 + $0x164] ss:$8 sps:$4 sm:$0xff]   ;;  %v644_v27 = vld [vmem:[%s930_s1 + $0x160] ss:$8 sps:$4 sm:$0xff]   ;;  %v647_v29 = vld [vmem:[%s930_s1 + $0x174] ss:$8 sps:$4 sm:$0xff]  }
   0xb   :  { %424 = vmatpush1.bf16.msra.mxu1 %v619_v10  ;;  %v649_v30 = vld [vmem:[%s930_s1 + $0x70] ss:$8 sps:$4 sm:$0xff]   ;;  %v651_v32 = vld [vmem:[%s930_s1 + $0x84] ss:$8 sps:$4 sm:$0xff]   ;;  %v655_v34 = vld [vmem:[%s930_s1 + $0x80] ss:$8 sps:$4 sm:$0xff]  }
   0xc   :  { %467 = vmatpush1.bf16.msra.mxu0 %v620_v11  ;;  %425 = vmatprep.subr.bf16.mxu1 %v621_v12  ;;  %v650_v31 = vld [vmem:[%s930_s1 + $0x170] ss:$8 sps:$4 sm:$0xff]   ;;  %v653_v33 = vld [vmem:[%s930_s1 + $0x184] ss:$8 sps:$4 sm:$0xff]   ;;  %v656_v35 = vld [vmem:[%s930_s1 + $0x180] ss:$8 sps:$4 sm:$0xff]  }
   0xd   :  { %468 = vmatprep.subr.bf16.mxu0 %v623_v13  ;;  %v657_v36 = vld [vmem:[%s930_s1 + $0x94] ss:$8 sps:$4 sm:$0xff]   ;;  %v661_v38 = vld [vmem:[%s930_s1 + $0x90] ss:$8 sps:$4 sm:$0xff]   ;;  %v663_v40 = vld [vmem:[%s930_s1 + $0xa4] ss:$8 sps:$4 sm:$0xff]  }
   0xe   :  { %v659_v37 = vld [vmem:[%s930_s1 + $0x194] ss:$8 sps:$4 sm:$0xff]   ;;  %v662_v39 = vld [vmem:[%s930_s1 + $0x190] ss:$8 sps:$4 sm:$0xff]   ;;  %v665_v41 = vld [vmem:[%s930_s1 + $0x1a4] ss:$8 sps:$4 sm:$0xff]  }
   0xf   :  { %426 = vmatpush1.bf16.msra.mxu1 %v625_v14  ;;  %v667_v42 = vld [vmem:[%s930_s1 + $0xa0] ss:$8 sps:$4 sm:$0xff]   ;;  %v669_v44 = vld [vmem:[%s930_s1 + $0xb4] ss:$8 sps:$4 sm:$0xff]   ;;  %v673_v46 = vld [vmem:[%s930_s1 + $0xb0] ss:$8 sps:$4 sm:$0xff]  }
  0x10   :  { %469 = vmatpush1.bf16.msra.mxu0 %v626_v15  ;;  %427 = vmatprep.subr.bf16.mxu1 %v627_v16  ;;  %v668_v43 = vld [vmem:[%s930_s1 + $0x1a0] ss:$8 sps:$4 sm:$0xff]   ;;  %v671_v45 = vld [vmem:[%s930_s1 + $0x1b4] ss:$8 sps:$4 sm:$0xff]   ;;  %v674_v48 = vld [vmem:[%s930_s1 + $0x1b0] ss:$8 sps:$4 sm:$0xff]  }
  0x11   :  { %470 = vmatprep.subr.bf16.mxu0 %v629_v17  ;;  %v701_v47 = vld [vmem:[%s931_s0 + $0x4] ss:$16 sps:$4 sm:$0xff]   ;;  %v704_v51 = vld [vmem:[%s931_s0 + $0xc] ss:$16 sps:$4 sm:$0xff]   ;;  %v679_v52 = vld [vmem:[%s930_s1 + $0xc0] ss:$8 sps:$4 sm:$0xff]  }
  0x12   :  { %v675_v49 = vld [vmem:[%s930_s1 + $0xc4] ss:$8 sps:$4 sm:$0xff]   ;;  %451 = vmatprep.mubr.bf16.mxu1 %v701_v47  ;;  %494 = vmatprep.mubr.bf16.mxu0 %v704_v51  ;;  %v680_v53 = vld [vmem:[%s930_s1 + $0x1c0] ss:$8 sps:$4 sm:$0xff]   ;;  %v681_v54 = vld [vmem:[%s930_s1 + $0xd4] ss:$8 sps:$4 sm:$0xff]  }
  0x13   :  { %428 = vmatpush1.bf16.msra.mxu1 %v631_v18  ;;  %v677_v50 = vld [vmem:[%s930_s1 + $0x1c4] ss:$8 sps:$4 sm:$0xff]   ;;  %v683_v55 = vld [vmem:[%s930_s1 + $0x1d4] ss:$8 sps:$4 sm:$0xff]   ;;  %v685_v56 = vld [vmem:[%s930_s1 + $0xd0] ss:$8 sps:$4 sm:$0xff]  }
  0x14   :  { %471 = vmatpush1.bf16.msra.mxu0 %v632_v19  ;;  %429 = vmatprep.subr.bf16.mxu1 %v633_v20  ;;  %v686_v57 = vld [vmem:[%s930_s1 + $0x1d0] ss:$8 sps:$4 sm:$0xff]   ;;  %v687_v58 = vld [vmem:[%s930_s1 + $0xe4] ss:$8 sps:$4 sm:$0xff]   ;;  %v691_v60 = vld [vmem:[%s930_s1 + $0xe0] ss:$8 sps:$4 sm:$0xff]  }
  0x15   :  { %472 = vmatprep.subr.bf16.mxu0 %v635_v21  ;;  %v689_v59 = vld [vmem:[%s930_s1 + $0x1e4] ss:$8 sps:$4 sm:$0xff]   ;;  %v692_v61 = vld [vmem:[%s930_s1 + $0x1e0] ss:$8 sps:$4 sm:$0xff]   ;;  %v693_v62 = vld [vmem:[%s930_s1 + $0xf4] ss:$8 sps:$4 sm:$0xff]  }
  0x16   :  { %v695_v63 = vld [vmem:[%s930_s1 + $0x1f4] ss:$8 sps:$4 sm:$0xff]   ;;  %v697_v0 = vld [vmem:[%s930_s1 + $0xf0] ss:$8 sps:$4 sm:$0xff]  }
  0x17   :  { %430 = vmatpush1.bf16.msra.mxu1 %v637_v22  ;;  %v698_v1 = vld [vmem:[%s930_s1 + $0x1f0] ss:$8 sps:$4 sm:$0xff]  }
  0x18   :  { %473 = vmatpush1.bf16.msra.mxu0 %v638_v23  ;;  %431 = vmatprep.subr.bf16.mxu1 %v639_v24  ;;  %v699_v2 = vld [vmem:[%s931_s0] ss:$16 sps:$4 sm:$0xff]   ;;  %v702_v3 = vld [vmem:[%s931_s0 + $0x8] ss:$16 sps:$4 sm:$0xff]  }
  0x19   :  { %474 = vmatprep.subr.bf16.mxu0 %v641_v25 }
  0x1b   :  { %432 = vmatpush1.bf16.msra.mxu1 %v643_v26 }
  0x1c   :  { %475 = vmatpush1.bf16.msra.mxu0 %v644_v27  ;;  %433 = vmatprep.subr.bf16.mxu1 %v645_v28 }
  0x1d   :  { %476 = vmatprep.subr.bf16.mxu0 %v647_v29 }
  0x1f   :  { %434 = vmatpush1.bf16.msra.mxu1 %v649_v30 }
  0x20   :  { %477 = vmatpush1.bf16.msra.mxu0 %v650_v31  ;;  %435 = vmatprep.subr.bf16.mxu1 %v651_v32 }
  0x21   :  { %478 = vmatprep.subr.bf16.mxu0 %v653_v33 }
  0x23   :  { %436 = vmatpush1.bf16.msra.mxu1 %v655_v34 }
  0x24   :  { %479 = vmatpush1.bf16.msra.mxu0 %v656_v35  ;;  %437 = vmatprep.subr.bf16.mxu1 %v657_v36 }
  0x25   :  { %480 = vmatprep.subr.bf16.mxu0 %v659_v37 }
  0x27   :  { %438 = vmatpush1.bf16.msra.mxu1 %v661_v38 }
  0x28   :  { %481 = vmatpush1.bf16.msra.mxu0 %v662_v39  ;;  %439 = vmatprep.subr.bf16.mxu1 %v663_v40 }
  0x29   :  { %482 = vmatprep.subr.bf16.mxu0 %v665_v41 }
  0x2b   :  { %440 = vmatpush1.bf16.msra.mxu1 %v667_v42 }
  0x2c   :  { %483 = vmatpush1.bf16.msra.mxu0 %v668_v43  ;;  %441 = vmatprep.subr.bf16.mxu1 %v669_v44 }
  0x2d   :  { %484 = vmatprep.subr.bf16.mxu0 %v671_v45 }
  0x2f   :  { %442 = vmatpush1.bf16.msra.mxu1 %v673_v46 }
  0x30   :  { %485 = vmatpush1.bf16.msra.mxu0 %v674_v48  ;;  %443 = vmatprep.subr.bf16.mxu1 %v675_v49 }
  0x31   :  { %486 = vmatprep.subr.bf16.mxu0 %v677_v50 }
  0x33   :  { %444 = vmatpush1.bf16.msra.mxu1 %v679_v52 }
  0x34   :  { %487 = vmatpush1.bf16.msra.mxu0 %v680_v53  ;;  %445 = vmatprep.subr.bf16.mxu1 %v681_v54 }
  0x35   :  { %488 = vmatprep.subr.bf16.mxu0 %v683_v55 }
  0x37   :  { %446 = vmatpush1.bf16.msra.mxu1 %v685_v56 }
  0x38   :  { %489 = vmatpush1.bf16.msra.mxu0 %v686_v57  ;;  %447 = vmatprep.subr.bf16.mxu1 %v687_v58 }
  0x39   :  { %490 = vmatprep.subr.bf16.mxu0 %v689_v59 }
  0x3b   :  { %448 = vmatpush1.bf16.msra.mxu1 %v691_v60 }
  0x3c   :  { %491 = vmatpush1.bf16.msra.mxu0 %v692_v61  ;;  %449 = vmatprep.subr.bf16.mxu1 %v693_v62 }
  0x3d   :  { %492 = vmatprep.subr.bf16.mxu0 %v695_v63 }
  0x3f   :  { %450 = vmatpush1.bf16.msra.mxu1 %v697_v0 }
  0x40   :  { %493 = vmatpush1.bf16.msra.mxu0 %v698_v1 }
  0x42   :  { %452 = vmatmul.mubr.bf16.vlgmr.msra.gmra.mrb[0].mxu1 %v699_v2 }
  0x43   :  { %495 = vmatmul.mubr.bf16.vlgmr.msra.gmra.mrb[0].mxu0 %v702_v3 }
 0x115   :  { %v453_v4 = vpop.f32.mrb[0].mxu1 }
 0x116   :  { %v496_v5 = vpop.f32.mrb[0].mxu0  ;;  %v455_v7 = vpop.f32.mrb[1].mxu1 }
 0x117   :  { %v497_v6 = vadd.f32 %v496_v5, %v453_v4  ;;  %v498_v8 = vpop.f32.mrb[1].mxu0  ;;  %v457_v10 = vpop.f32.mrb[2].mxu1 }
 0x118   :  { %v499_v9 = vadd.f32 %v498_v8, %v455_v7  ;;  %v500_v11 = vpop.f32.mrb[2].mxu0  ;;  %v459_v14 = vpop.f32.mrb[3].mxu1 }
 0x119   :  { %v505_v12 = vmax.f32 %v497_v6, 0.0  ;;  %v501_v13 = vadd.f32 %v500_v11, %v457_v10  ;;  %v502_v15 = vpop.f32.mrb[3].mxu0 }
 0x11a   :  { %v506_v16 = vmax.f32 %v499_v9, 0.0  ;;  %v503_v17 = vadd.f32 %v502_v15, %v459_v14 }
 0x11b   :  { %v507_v18 = vmax.f32 %v501_v13, 0.0 }
 0x11c   :  { %v597_v19 = vpack.c.bf16 %v506_v16, %v505_v12  ;;  %v508_v20 = vmax.f32 %v503_v17, 0.0 }
 0x11e   :  { %521 = vst [vmem:[%s932_s2] sm:$0xff] %v597_v19  ;;  %v598_v21 = vpack.c.bf16 %v508_v20, %v507_v18 }
 0x120   :  { %522 = vst [vmem:[%s932_s2 + $0x8] sm:$0xff] %v598_v21 }

// kernel: _forward_impl.11
= control target key start
LH: loop header
LB: loop body
LE: loop exit
PB: predicated region body
PF: predicated region fallthrough
CT: control target
= control target key end

     0   :  { %s333_s1 = inlined_call_operand.vmem [shape: bf16[256,128], index: 1, kind: input, shape index: {}]   ;;  %s334_s0 = inlined_call_operand.vmem [shape: bf16[16,256], index: 0, kind: input, shape index: {}]   ;;  %s335_s2 = inlined_call_operand.vmem [shape: f32[16,128], index: 2, kind: output, shape index: {}]  }
   0x1   :  { %v239_v0 = vld [vmem:[%s333_s1 + $0x40] sm:$0xff]   ;;  %v241_v2 = vld [vmem:[%s333_s1 + $0x48] sm:$0xff]   ;;  %v243_v4 = vld [vmem:[%s333_s1 + $0x50] sm:$0xff]  }
   0x2   :  { %v240_v1 = vld [vmem:[%s333_s1] sm:$0xff]   ;;  %217 = vmatprep.subr.bf16.mxu0 %v239_v0  ;;  %v242_v3 = vld [vmem:[%s333_s1 + $0x8] sm:$0xff]   ;;  %v244_v5 = vld [vmem:[%s333_s1 + $0x10] sm:$0xff]  }
   0x3   :  { %218 = vmatpush3.bf16.msra.mxu0 %v240_v1  ;;  %v245_v6 = vld [vmem:[%s333_s1 + $0x58] sm:$0xff]   ;;  %v247_v8 = vld [vmem:[%s333_s1 + $0x60] sm:$0xff]   ;;  %v249_v10 = vld [vmem:[%s333_s1 + $0x68] sm:$0xff]  }
   0x4   :  { %219 = vmatprep.subr.bf16.mxu0 %v241_v2  ;;  %v246_v7 = vld [vmem:[%s333_s1 + $0x18] sm:$0xff]   ;;  %v248_v9 = vld [vmem:[%s333_s1 + $0x20] sm:$0xff]   ;;  %v250_v12 = vld [vmem:[%s333_s1 + $0x28] sm:$0xff]  }
   0x5   :  { %v257_v11 = vld [vmem:[%s334_s0 + $0x4] ss:$8 sps:$4 sm:$0xff]   ;;  %v251_v13 = vld [vmem:[%s333_s1 + $0x70] sm:$0xff]   ;;  %v253_v15 = vld [vmem:[%s333_s1 + $0x78] sm:$0xff]  }
   0x6   :  { %184 = vmatprep.mubr.bf16.mxu0 %v257_v11  ;;  %v252_v14 = vld [vmem:[%s333_s1 + $0x30] sm:$0xff]   ;;  %v254_v16 = vld [vmem:[%s333_s1 + $0x38] sm:$0xff]   ;;  %v255_v17 = vld [vmem:[%s334_s0] ss:$8 sps:$4 sm:$0xff]  }
   0x7   :  { %220 = vmatpush3.bf16.msra.mxu0 %v242_v3 }
   0x8   :  { %221 = vmatprep.subr.bf16.mxu0 %v243_v4 }
   0xb   :  { %222 = vmatpush3.bf16.msra.mxu0 %v244_v5 }
   0xc   :  { %223 = vmatprep.subr.bf16.mxu0 %v245_v6 }
   0xf   :  { %224 = vmatpush3.bf16.msra.mxu0 %v246_v7 }
  0x10   :  { %225 = vmatprep.subr.bf16.mxu0 %v247_v8 }
  0x13   :  { %226 = vmatpush3.bf16.msra.mxu0 %v248_v9 }
  0x14   :  { %227 = vmatprep.subr.bf16.mxu0 %v249_v10 }
  0x17   :  { %228 = vmatpush3.bf16.msra.mxu0 %v250_v12 }
  0x18   :  { %229 = vmatprep.subr.bf16.mxu0 %v251_v13 }
  0x1b   :  { %230 = vmatpush3.bf16.msra.mxu0 %v252_v14 }
  0x1c   :  { %231 = vmatprep.subr.bf16.mxu0 %v253_v15 }
  0x1f   :  { %232 = vmatpush3.bf16.msra.mxu0 %v254_v16 }
  0x22   :  { %185 = vmatmul.mubr.bf16.vlgmr.msra.gmra.mrb[0].mxu0 %v255_v17 }
  0xf5   :  { %v233_v18 = vpop.f32.mrb[0].mxu0 }
  0xf6   :  { %v234_v19 = vpop.f32.mrb[1].mxu0 }
  0xf7   :  { %v235_v20 = vadd.f32 %v234_v19, %v233_v18  ;;  %v236_v21 = vpop.f32.mrb[2].mxu0 }
  0xf8   :  { %v237_v22 = vpop.f32.mrb[3].mxu0 }
  0xf9   :  { %193 = vst [vmem:[%s335_s2] sm:$0xff] %v235_v20  ;;  %v238_v23 = vadd.f32 %v237_v22, %v236_v21 }
  0xfb   :  { %194 = vst [vmem:[%s335_s2 + $0x8] sm:$0xff] %v238_v23 }

</bundles_post_ra>
